<compile_context>
chip_gen: v5e
topology: v5e:2x2
jax: 0.10.0
libtpu: 0.0.40
codegen_flags: <defaults>
</compile_context>

<pallas_src>
import functools

import jax
import jax.numpy as jnp
from jax.experimental import pallas as pl
from jax.experimental.pallas import tpu as pltpu

BN_EPS = 1e-5
K = 8        # Conv1d kernel size
CPAD = 4     # Conv1d padding. NOTE: 2*CPAD >= K-1, so batch-folded windows
             # never mix valid rows of adjacent examples.


def _layer_dims(L):
    """Input length L -> (conv output length, pooled output length)."""
    Lc = L + 2 * CPAD - K + 1          # Conv1d stride 1
    n = Lc // 2 + 1                    # MaxPool1d(kernel=2, stride=2, padding=1)
    return Lc, n


def _seq_dims(L0):
    dims, L = [], L0
    for _ in range(3):
        Lc, n = _layer_dims(L)
        dims.append((Lc, n))
        L = n
    return dims


def _out_len(L0):
    return _seq_dims(L0)[-1][1]


# ----------------------------- fused Pallas kernel ---------------------------

def _tfc_branch_kernel(x1_ref, w1_ref, b1_ref, w2_ref, b2_ref, w3_ref, b3_ref,
                       pw1_ref, pb1_ref, pw2_ref, pb2_ref,
                       feat_ref, z_ref,
                       stage1, stage2, stage3, buf1, buf2,
                       *, B, dims):
    """One branch: 3x [Conv1d+BN+ReLU+MaxPool] + Linear+BN+ReLU+Linear, fused.

    x1_ref : (B*Lc1, K*Cin) bf16 — layer-1 im2col, batch folded into rows.
    wX_ref : (K*Cin_x, Cout_x) bf16 — conv taps concatenated along contraction,
             BN scale folded.   bX_ref: (1, Cout_x) f32 BN shift.
    pw1_ref: (n3, C3, H1) bf16 — projector W1, rows permuted to length-major,
             BN folded.         pb1_ref: (1, H1) f32.
    pw2_ref: (H1, H2) bf16.     pb2_ref: (1, H2) f32.
    feat_ref: (B, n3, C3) f32 pooled features (length-major, channels-last).
    z_ref  : (B, H2) f32 projector output.
    """
    (Lc1, n1, C1), (Lc2, n2, C2), (Lc3, n3, C3) = dims
    s1 = n1 + 2 * CPAD                  # per-example row stride in buf1
    s2 = n2 + 2 * CPAD                  # per-example row stride in buf2

    # One-time zero init per branch: the pool pad rows (stage row 0 / trailing
    # row) and the conv zero-pad rows of buf1/buf2 stay zero for the whole
    # branch — no per-example / per-layer zero fills.
    stage1[...] = jnp.zeros((2 * n1, C1), jnp.float32)
    stage2[...] = jnp.zeros((2 * n2, C2), jnp.float32)
    stage3[...] = jnp.zeros((2 * n3, C3), jnp.float32)
    buf1[...] = jnp.zeros((B * s1, C1), jnp.bfloat16)
    buf2[...] = jnp.zeros((B * s2, C2), jnp.bfloat16)

    def conv(g, w_ref, b_ref):
        # One fat MXU matmul per layer (contraction = K*Cin), f32 accumulate,
        # bias (folded BN shift) + ReLU in f32.
        acc = jnp.dot(g, w_ref[...], preferred_element_type=jnp.float32)
        return jnp.maximum(acc + b_ref[...], 0.0)

    def pool(y, stage, Lc, n):
        # MaxPool1d(k=2, s=2, padding=1): pooled[i] = max(y[2i-1], y[2i]).
        # Zero padding (stage rows 0 and 2n-1 when unused) is exact because
        # y >= 0 after ReLU (PyTorch pads with -inf).
        stage[1:1 + Lc, :] = y
        even = stage[pl.ds(0, n, stride=2), :]      # -> y[2i-1]  (row 0 = pad)
        odd = stage[pl.ds(1, n, stride=2), :]       # -> y[2i]
        return jnp.maximum(even, odd)               # (n, C) f32

    # ---------------- layer 1: Cin -> C1 (pre-im2col'd input) ----------------
    y1 = conv(x1_ref[...], w1_ref, b1_ref)          # (B*Lc1, C1) f32
    for bi in range(B):
        p1 = pool(y1[bi * Lc1:(bi + 1) * Lc1, :], stage1, Lc1, n1)
        buf1[bi * s1 + CPAD:bi * s1 + CPAD + n1, :] = p1.astype(jnp.bfloat16)
    # Dropout(0.35) after layer 1 is the identity in eval mode.

    # ---------------- layer 2: C1 -> C2 (batch-wide windows) -----------------
    M2 = B * s1 - (K - 1)
    g2 = jnp.concatenate([buf1[k:k + M2, :] for k in range(K)], axis=1)
    y2 = conv(g2, w2_ref, b2_ref)                   # (M2, C2) f32
    for bi in range(B):
        p2 = pool(y2[bi * s1:bi * s1 + Lc2, :], stage2, Lc2, n2)
        buf2[bi * s2 + CPAD:bi * s2 + CPAD + n2, :] = p2.astype(jnp.bfloat16)

    # ---------------- layer 3: C2 -> C3 ----------------
    M3 = B * s2 - (K - 1)
    g3 = jnp.concatenate([buf2[k:k + M3, :] for k in range(K)], axis=1)
    y3 = conv(g3, w3_ref, b3_ref)                   # (M3, C3) f32
    for bi in range(B):
        feat_ref[bi, :, :] = pool(y3[bi * s2:bi * s2 + Lc3, :], stage3, Lc3, n3)

    # -------- projector: Linear + BN(folded) + ReLU + Linear, in VMEM --------
    # pw1 rows are pre-permuted so the length-major features are contracted
    # tap-by-tap (no activation transpose / reshape needed).
    P = feat_ref[...].astype(jnp.bfloat16)          # (B, n3, C3)
    z1 = jnp.dot(P[:, 0, :], pw1_ref[0], preferred_element_type=jnp.float32)
    for l in range(1, n3):
        z1 += jnp.dot(P[:, l, :], pw1_ref[l], preferred_element_type=jnp.float32)
    z1 = jnp.maximum(z1 + pb1_ref[...], 0.0)        # (B, H1) f32
    z = jnp.dot(z1.astype(jnp.bfloat16), pw2_ref[...],
                preferred_element_type=jnp.float32) + pb2_ref[...]
    z_ref[...] = z.astype(z_ref.dtype)


# ------------------------------ pallas wrapper --------------------------------

def tfc_fused_both(x1_both, cp, pp, *, B, dims):
    """x1_both: (2, B*Lc1, K*Cin) bf16 layer-1 im2col for both branches.
    Returns (feat (2,B,n3,C3) f32, z (2,B,128) f32)."""
    (Lc1, n1, C1), (Lc2, n2, C2), (Lc3, n3, C3) = dims
    s1, s2 = n1 + 2 * CPAD, n2 + 2 * CPAD
    nbr = x1_both.shape[0]
    H2 = pp["w2"].shape[-1]

    kernel = functools.partial(_tfc_branch_kernel, B=B, dims=tuple(dims))

    def bspec(arr):
        nd = arr.ndim
        return pl.BlockSpec((None,) + tuple(arr.shape[1:]),
                            lambda b, _n=nd: (b,) + (0,) * (_n - 1))

    args = (x1_both, cp["w1"], cp["b1"], cp["w2"], cp["b2"], cp["w3"], cp["b3"],
            pp["w1"], pp["b1"], pp["w2"], pp["b2"])
    in_specs = [bspec(a) for a in args]
    out_shape = (jax.ShapeDtypeStruct((nbr, B, n3, C3), jnp.float32),
                 jax.ShapeDtypeStruct((nbr, B, H2), jnp.float32))
    out_specs = (pl.BlockSpec((None, B, n3, C3), lambda b: (b, 0, 0, 0)),
                 pl.BlockSpec((None, B, H2), lambda b: (b, 0, 0)))
    scratch = [
        pltpu.VMEM((2 * n1, C1), jnp.float32),      # pool stage, layer 1
        pltpu.VMEM((2 * n2, C2), jnp.float32),      # pool stage, layer 2
        pltpu.VMEM((2 * n3, C3), jnp.float32),      # pool stage, layer 3
        pltpu.VMEM((B * s1, C1), jnp.bfloat16),     # layer-2 input (padded)
        pltpu.VMEM((B * s2, C2), jnp.bfloat16),     # layer-3 input (padded)
    ]
    return pl.pallas_call(
        kernel,
        out_shape=out_shape,
        grid=(nbr,),
        in_specs=in_specs,
        out_specs=out_specs,
        scratch_shapes=scratch,
        compiler_params=pltpu.CompilerParams(
            dimension_semantics=("parallel",)),
    )(*args)


# ---------------------------- parameter handling ------------------------------

def _bn_fold(bn):
    gamma, beta, mean, var = bn
    scale = gamma / jnp.sqrt(var + BN_EPS)
    shift = beta - mean * scale
    return scale, shift


def prepare_params(params, ts_length):
    """Fold eval-mode BN into static weights, concatenate conv taps along the
    contraction dim, permute projector W1 to length-major feature order, cast
    MXU operands to bf16 and stack the (time, freq) branches."""
    n3 = _seq_dims(ts_length)[-1][1]

    def conv_layer(w, bn):
        scale, shift = _bn_fold(bn)
        cout, cin, k = w.shape
        # PyTorch (Cout, Cin, K) -> rows ordered [k*Cin + c], BN scale folded.
        wt = jnp.transpose(w, (2, 1, 0)) * scale[None, None, :]   # (K, Cin, Cout)
        return (wt.reshape(k * cin, cout).astype(jnp.bfloat16),
                shift.reshape(1, -1).astype(jnp.float32))

    def conv_branch(layers):
        ws, bs = [], []
        for (w, bn) in layers:
            wf, bf = conv_layer(w, bn)
            ws.append(wf)
            bs.append(bf)
        return ws, bs

    wt_, bt_ = conv_branch(params["conv_t"])
    wf_, bf_ = conv_branch(params["conv_f"])
    conv = {}
    for i in range(3):
        conv[f"w{i + 1}"] = jnp.stack([wt_[i], wf_[i]])
        conv[f"b{i + 1}"] = jnp.stack([bt_[i], bf_[i]])

    def proj_branch(p):
        W1, b1, bn, W2, b2 = p
        scale, shift = _bn_fold(bn)
        H1, fc_in = W1.shape
        C3 = fc_in // n3
        # PyTorch consumes channel-major flattened features h[c*n3 + l]; permute
        # W1's input axis to (l, c) so the kernel contracts the length-major
        # pooled features without any transpose.  BN scale folded.
        w1 = W1.reshape(H1, C3, n3)                                # [o, c, l]
        w1 = jnp.transpose(w1, (2, 1, 0)) * scale[None, None, :]   # (n3, C3, H1)
        return (w1.astype(jnp.bfloat16),
                (b1 * scale + shift).reshape(1, -1).astype(jnp.float32),
                W2.T.astype(jnp.bfloat16),
                b2.reshape(1, -1).astype(jnp.float32))

    pt = proj_branch(params["proj_t"])
    pf = proj_branch(params["proj_f"])
    proj = {k: jnp.stack([a, b]) for k, (a, b) in
            zip(("w1", "b1", "w2", "b2"), zip(pt, pf))}
    return conv, proj


def init_params(key, input_channels, ts_length):
    chans = [(input_channels, 32), (32, 64), (64, 60)]
    fc_in = 60 * _out_len(ts_length)

    def bn_init(k, n):
        k1, k2, k3, k4 = jax.random.split(k, 4)
        gamma = 1.0 + 0.1 * jax.random.normal(k1, (n,), jnp.float32)
        beta = 0.1 * jax.random.normal(k2, (n,), jnp.float32)
        mean = 0.1 * jax.random.normal(k3, (n,), jnp.float32)
        var = 1.0 + 0.1 * jax.random.uniform(k4, (n,), jnp.float32)
        return gamma, beta, mean, var

    def conv_branch(k):
        layers = []
        for (cin, cout) in chans:
            k, kw, kb = jax.random.split(k, 3)
            w = 0.1 * jax.random.normal(kw, (cout, cin, K), jnp.float32)
            layers.append((w, bn_init(kb, cout)))
        return layers

    def proj(k):
        k1, k2, k3, k4, k5 = jax.random.split(k, 5)
        W1 = 0.05 * jax.random.normal(k1, (256, fc_in), jnp.float32)
        b1 = 0.05 * jax.random.normal(k2, (256,), jnp.float32)
        bn = bn_init(k3, 256)
        W2 = 0.05 * jax.random.normal(k4, (128, 256), jnp.float32)
        b2 = 0.05 * jax.random.normal(k5, (128,), jnp.float32)
        return (W1, b1, bn, W2, b2)

    kt, kf, kpt, kpf = jax.random.split(key, 4)
    return {
        "conv_t": conv_branch(kt),
        "conv_f": conv_branch(kf),
        "proj_t": proj(kpt),
        "proj_f": proj(kpf),
    }, fc_in


# ---------------------------------- forward -----------------------------------

def tfc_forward(conv_p, proj_p, x_in_t, x_in_f):
    B, cin, L0 = x_in_t.shape
    chans = [conv_p["w1"].shape[-1], conv_p["w2"].shape[-1], conv_p["w3"].shape[-1]]
    dims = tuple((lc, n, c) for (lc, n), c in zip(_seq_dims(L0), chans))
    (Lc1, n1, C1), (Lc2, n2, C2), (Lc3, n3, C3) = dims

    def prep(x):
        # NCL -> channels-last, conv zero-padding, layer-1 im2col (Cin is tiny),
        # batch folded into the matmul M dimension.
        x = jnp.transpose(x, (0, 2, 1))
        x = jnp.pad(x, ((0, 0), (CPAD, CPAD), (0, 0)))
        cols = jnp.concatenate([x[:, k:k + Lc1, :] for k in range(K)], axis=-1)
        return cols.reshape(B * Lc1, K * cin).astype(jnp.bfloat16)

    x1_both = jnp.stack([prep(x_in_t), prep(x_in_f)])       # (2, B*Lc1, K*Cin)

    feat, z = tfc_fused_both(x1_both, conv_p, proj_p, B=B, dims=dims)
    # h must match PyTorch's channel-major flatten of (B, C, L): tiny transpose
    # of the (2, B, n3, C3) features only — z was computed fully in VMEM inside
    # the kernel, so this is off the critical path.
    h = jnp.transpose(feat, (0, 1, 3, 2)).reshape(2, B, C3 * n3)
    return h[0], z[0], h[1], z[1]


# ------------------------------------ main -------------------------------------

if __name__ == "__main__":
    B, C_IN, TS_LEN = 2, 4, 16      # small shapes: batch=2, channels=4, seq=16
    key = jax.random.PRNGKey(0)
    kp, kx1, kx2 = jax.random.split(key, 3)

    params, fc_in = init_params(kp, C_IN, TS_LEN)
    conv_p, proj_p = prepare_params(params, TS_LEN)

    x_in_t = jax.random.normal(kx1, (B, C_IN, TS_LEN), jnp.float32)
    x_in_f = jax.random.normal(kx2, (B, C_IN, TS_LEN), jnp.float32)

    fwd = jax.jit(lambda a, b: tfc_forward(conv_p, proj_p, a, b))
    h_time, z_time, h_freq, z_freq = fwd(x_in_t, x_in_f)
    jax.block_until_ready((h_time, z_time, h_freq, z_freq))

    assert h_time.shape == (B, fc_in) and h_freq.shape == (B, fc_in)
    assert z_time.shape == (B, 128) and z_freq.shape == (B, 128)
    print("KERNEL_OK")
</pallas_src>

<mosaic_0001>
module attributes {stable_mosaic.version = 11 : i64} {
  func.func @_tfc_branch_kernel(%arg0: i32, %arg1: memref<1x34x32xbf16, #tpu.memory_space<vmem>>, %arg2: memref<1x32x32xbf16, #tpu.memory_space<vmem>>, %arg3: memref<1x1x32xf32, #tpu.memory_space<vmem>>, %arg4: memref<1x256x64xbf16, #tpu.memory_space<vmem>>, %arg5: memref<1x1x64xf32, #tpu.memory_space<vmem>>, %arg6: memref<1x512x60xbf16, #tpu.memory_space<vmem>>, %arg7: memref<1x1x60xf32, #tpu.memory_space<vmem>>, %arg8: memref<1x4x60x256xbf16, #tpu.memory_space<vmem>>, %arg9: memref<1x1x256xf32, #tpu.memory_space<vmem>>, %arg10: memref<1x256x128xbf16, #tpu.memory_space<vmem>>, %arg11: memref<1x1x128xf32, #tpu.memory_space<vmem>>, %arg12: memref<1x2x4x60xf32, #tpu.memory_space<vmem>>, %arg13: memref<1x2x128xf32, #tpu.memory_space<vmem>>, %arg14: memref<18x32xf32, #tpu.memory_space<vmem>>, %arg15: memref<12x64xf32, #tpu.memory_space<vmem>>, %arg16: memref<8x60xf32, #tpu.memory_space<vmem>>, %arg17: memref<34x32xbf16, #tpu.memory_space<vmem>>, %arg18: memref<28x64xbf16, #tpu.memory_space<vmem>>) attributes {dimension_semantics = [#tpu.dimension_semantics<parallel>], iteration_bounds = array<i64: 2>, scalar_prefetch = 0 : i64, scratch_operands = 5 : i64, tpu.core_type = #tpu.core_type<tc>, window_params = [{transform_indices = @transform_0, window_bounds = array<i64: 1, 34, 32>}, {transform_indices = @transform_1, window_bounds = array<i64: 1, 32, 32>}, {transform_indices = @transform_2, window_bounds = array<i64: 1, 1, 32>}, {transform_indices = @transform_3, window_bounds = array<i64: 1, 256, 64>}, {transform_indices = @transform_4, window_bounds = array<i64: 1, 1, 64>}, {transform_indices = @transform_5, window_bounds = array<i64: 1, 512, 60>}, {transform_indices = @transform_6, window_bounds = array<i64: 1, 1, 60>}, {transform_indices = @transform_7, window_bounds = array<i64: 1, 4, 60, 256>}, {transform_indices = @transform_8, window_bounds = array<i64: 1, 1, 256>}, {transform_indices = @transform_9, window_bounds = array<i64: 1, 256, 128>}, {transform_indices = @transform_10, window_bounds = array<i64: 1, 1, 128>}, {transform_indices = @transform_11, window_bounds = array<i64: 1, 2, 4, 60>}, {transform_indices = @transform_12, window_bounds = array<i64: 1, 2, 128>}]} {
    %cst = arith.constant 0.000000e+00 : f32
    %0 = vector.broadcast %cst : f32 to vector<18x32xf32>
    %c0 = arith.constant 0 : index
    %c0_0 = arith.constant 0 : index
    %1 = vector.load %arg14[%c0, %c0_0] : memref<18x32xf32, #tpu.memory_space<vmem>>, vector<18x32xf32>
    tpu.vector_store %arg14[%c0, %c0_0], %0 {strides = array<i32>} : memref<18x32xf32, #tpu.memory_space<vmem>>, vector<18x32xf32>,
    %cst_1 = arith.constant 0.000000e+00 : f32
    %2 = vector.broadcast %cst_1 : f32 to vector<12x64xf32>
    %c0_2 = arith.constant 0 : index
    %c0_3 = arith.constant 0 : index
    %3 = vector.load %arg15[%c0_2, %c0_3] : memref<12x64xf32, #tpu.memory_space<vmem>>, vector<12x64xf32>
    tpu.vector_store %arg15[%c0_2, %c0_3], %2 {strides = array<i32>} : memref<12x64xf32, #tpu.memory_space<vmem>>, vector<12x64xf32>,
    %cst_4 = arith.constant 0.000000e+00 : f32
    %4 = vector.broadcast %cst_4 : f32 to vector<8x60xf32>
    %c0_5 = arith.constant 0 : index
    %c0_6 = arith.constant 0 : index
    %5 = vector.load %arg16[%c0_5, %c0_6] : memref<8x60xf32, #tpu.memory_space<vmem>>, vector<8x60xf32>
    tpu.vector_store %arg16[%c0_5, %c0_6], %4 {strides = array<i32>} : memref<8x60xf32, #tpu.memory_space<vmem>>, vector<8x60xf32>,
    %cst_7 = arith.constant 0.000000e+00 : bf16
    %6 = vector.broadcast %cst_7 : bf16 to vector<34x32xbf16>
    %c0_8 = arith.constant 0 : index
    %c0_9 = arith.constant 0 : index
    %7 = vector.load %arg17[%c0_8, %c0_9] : memref<34x32xbf16, #tpu.memory_space<vmem>>, vector<34x32xbf16>
    tpu.vector_store %arg17[%c0_8, %c0_9], %6 {strides = array<i32>} : memref<34x32xbf16, #tpu.memory_space<vmem>>, vector<34x32xbf16>,
    %cst_10 = arith.constant 0.000000e+00 : bf16
    %8 = vector.broadcast %cst_10 : bf16 to vector<28x64xbf16>
    %c0_11 = arith.constant 0 : index
    %c0_12 = arith.constant 0 : index
    %9 = vector.load %arg18[%c0_11, %c0_12] : memref<28x64xbf16, #tpu.memory_space<vmem>>, vector<28x64xbf16>
    tpu.vector_store %arg18[%c0_11, %c0_12], %8 {strides = array<i32>} : memref<28x64xbf16, #tpu.memory_space<vmem>>, vector<28x64xbf16>,
    %c0_13 = arith.constant 0 : index
    %c0_14 = arith.constant 0 : index
    %c0_15 = arith.constant 0 : index
    %10 = vector.load %arg1[%c0_13, %c0_14, %c0_15] : memref<1x34x32xbf16, #tpu.memory_space<vmem>>, vector<1x34x32xbf16>
    %11 = vector.shape_cast %10 : vector<1x34x32xbf16> to vector<34x32xbf16>
    %c0_16 = arith.constant 0 : index
    %c0_17 = arith.constant 0 : index
    %c0_18 = arith.constant 0 : index
    %12 = vector.load %arg2[%c0_16, %c0_17, %c0_18] : memref<1x32x32xbf16, #tpu.memory_space<vmem>>, vector<1x32x32xbf16>
    %13 = vector.shape_cast %12 : vector<1x32x32xbf16> to vector<32x32xbf16>
    %cst_19 = arith.constant dense<0.000000e+00> : vector<34x32xf32>
    %14 = tpu.matmul %11, %13, %cst_19 {dimension_numbers = #tpu.dot_dimension_numbers<[1], [0], [0], [1], [0, 0, 1, 1], [], []>} : vector<34x32xbf16>, vector<32x32xbf16>, vector<34x32xf32> -> vector<34x32xf32>
    %c0_20 = arith.constant 0 : index
    %c0_21 = arith.constant 0 : index
    %c0_22 = arith.constant 0 : index
    %15 = vector.load %arg3[%c0_20, %c0_21, %c0_22] : memref<1x1x32xf32, #tpu.memory_space<vmem>>, vector<1x1x32xf32>
    %16 = vector.shape_cast %15 : vector<1x1x32xf32> to vector<1x32xf32>
    %17 = vector.broadcast %16 : vector<1x32xf32> to vector<34x32xf32>
    %18 = arith.addf %14, %17 : vector<34x32xf32>
    %cst_23 = arith.constant 0.000000e+00 : f32
    %19 = vector.broadcast %cst_23 : f32 to vector<34x32xf32>
    %20 = arith.maximumf %18, %19 : vector<34x32xf32>
    %21 = vector.extract_strided_slice %20 {offsets = [0, 0], sizes = [17, 32], strides = [1, 1]} : vector<34x32xf32> to vector<17x32xf32>
    %c1 = arith.constant 1 : index
    %c0_24 = arith.constant 0 : index
    %22 = vector.load %arg14[%c1, %c0_24] : memref<18x32xf32, #tpu.memory_space<vmem>>, vector<17x32xf32>
    tpu.vector_store %arg14[%c1, %c0_24], %21 {strides = array<i32>} : memref<18x32xf32, #tpu.memory_space<vmem>>, vector<17x32xf32>,
    %c0_25 = arith.constant 0 : index
    %c0_26 = arith.constant 0 : index
    %23 = tpu.strided_load %arg14[%c0_25, %c0_26] {strides = array<i32: 2, 1>} : memref<18x32xf32, #tpu.memory_space<vmem>>, vector<9x32xf32>
    %c1_27 = arith.constant 1 : index
    %c0_28 = arith.constant 0 : index
    %24 = tpu.strided_load %arg14[%c1_27, %c0_28] {strides = array<i32: 2, 1>} : memref<18x32xf32, #tpu.memory_space<vmem>>, vector<9x32xf32>
    %25 = arith.maximumf %23, %24 : vector<9x32xf32>
    %26 = arith.truncf %25 : vector<9x32xf32> to vector<9x32xbf16>
    %c4 = arith.constant 4 : index
    %c0_29 = arith.constant 0 : index
    %27 = vector.load %arg17[%c4, %c0_29] : memref<34x32xbf16, #tpu.memory_space<vmem>>, vector<9x32xbf16>
    tpu.vector_store %arg17[%c4, %c0_29], %26 {strides = array<i32>} : memref<34x32xbf16, #tpu.memory_space<vmem>>, vector<9x32xbf16>,
    %28 = vector.extract_strided_slice %20 {offsets = [17, 0], sizes = [17, 32], strides = [1, 1]} : vector<34x32xf32> to vector<17x32xf32>
    %c1_30 = arith.constant 1 : index
    %c0_31 = arith.constant 0 : index
    %29 = vector.load %arg14[%c1_30, %c0_31] : memref<18x32xf32, #tpu.memory_space<vmem>>, vector<17x32xf32>
    tpu.vector_store %arg14[%c1_30, %c0_31], %28 {strides = array<i32>} : memref<18x32xf32, #tpu.memory_space<vmem>>, vector<17x32xf32>,
    %c0_32 = arith.constant 0 : index
    %c0_33 = arith.constant 0 : index
    %30 = tpu.strided_load %arg14[%c0_32, %c0_33] {strides = array<i32: 2, 1>} : memref<18x32xf32, #tpu.memory_space<vmem>>, vector<9x32xf32>
    %c1_34 = arith.constant 1 : index
    %c0_35 = arith.constant 0 : index
    %31 = tpu.strided_load %arg14[%c1_34, %c0_35] {strides = array<i32: 2, 1>} : memref<18x32xf32, #tpu.memory_space<vmem>>, vector<9x32xf32>
    %32 = arith.maximumf %30, %31 : vector<9x32xf32>
    %33 = arith.truncf %32 : vector<9x32xf32> to vector<9x32xbf16>
    %c21 = arith.constant 21 : index
    %c0_36 = arith.constant 0 : index
    %34 = vector.load %arg17[%c21, %c0_36] : memref<34x32xbf16, #tpu.memory_space<vmem>>, vector<9x32xbf16>
    tpu.vector_store %arg17[%c21, %c0_36], %33 {strides = array<i32>} : memref<34x32xbf16, #tpu.memory_space<vmem>>, vector<9x32xbf16>,
    %c0_37 = arith.constant 0 : index
    %c0_38 = arith.constant 0 : index
    %35 = vector.load %arg17[%c0_37, %c0_38] : memref<34x32xbf16, #tpu.memory_space<vmem>>, vector<27x32xbf16>
    %c1_39 = arith.constant 1 : index
    %c0_40 = arith.constant 0 : index
    %36 = vector.load %arg17[%c1_39, %c0_40] : memref<34x32xbf16, #tpu.memory_space<vmem>>, vector<27x32xbf16>
    %c2 = arith.constant 2 : index
    %c0_41 = arith.constant 0 : index
    %37 = vector.load %arg17[%c2, %c0_41] : memref<34x32xbf16, #tpu.memory_space<vmem>>, vector<27x32xbf16>
    %c3 = arith.constant 3 : index
    %c0_42 = arith.constant 0 : index
    %38 = vector.load %arg17[%c3, %c0_42] : memref<34x32xbf16, #tpu.memory_space<vmem>>, vector<27x32xbf16>
    %c4_43 = arith.constant 4 : index
    %c0_44 = arith.constant 0 : index
    %39 = vector.load %arg17[%c4_43, %c0_44] : memref<34x32xbf16, #tpu.memory_space<vmem>>, vector<27x32xbf16>
    %c5 = arith.constant 5 : index
    %c0_45 = arith.constant 0 : index
    %40 = vector.load %arg17[%c5, %c0_45] : memref<34x32xbf16, #tpu.memory_space<vmem>>, vector<27x32xbf16>
    %c6 = arith.constant 6 : index
    %c0_46 = arith.constant 0 : index
    %41 = vector.load %arg17[%c6, %c0_46] : memref<34x32xbf16, #tpu.memory_space<vmem>>, vector<27x32xbf16>
    %c7 = arith.constant 7 : index
    %c0_47 = arith.constant 0 : index
    %42 = vector.load %arg17[%c7, %c0_47] : memref<34x32xbf16, #tpu.memory_space<vmem>>, vector<27x32xbf16>
    %43 = tpu.concatenate %35, %36, %37, %38, %39, %40, %41, %42 in 1 : vector<27x32xbf16>, vector<27x32xbf16>, vector<27x32xbf16>, vector<27x32xbf16>, vector<27x32xbf16>, vector<27x32xbf16>, vector<27x32xbf16>, vector<27x32xbf16> -> vector<27x256xbf16>
    %c0_48 = arith.constant 0 : index
    %c0_49 = arith.constant 0 : index
    %c0_50 = arith.constant 0 : index
    %44 = vector.load %arg4[%c0_48, %c0_49, %c0_50] : memref<1x256x64xbf16, #tpu.memory_space<vmem>>, vector<1x256x64xbf16>
    %45 = vector.shape_cast %44 : vector<1x256x64xbf16> to vector<256x64xbf16>
    %cst_51 = arith.constant dense<0.000000e+00> : vector<27x64xf32>
    %46 = tpu.matmul %43, %45, %cst_51 {dimension_numbers = #tpu.dot_dimension_numbers<[1], [0], [0], [1], [0, 0, 1, 1], [], []>} : vector<27x256xbf16>, vector<256x64xbf16>, vector<27x64xf32> -> vector<27x64xf32>
    %c0_52 = arith.constant 0 : index
    %c0_53 = arith.constant 0 : index
    %c0_54 = arith.constant 0 : index
    %47 = vector.load %arg5[%c0_52, %c0_53, %c0_54] : memref<1x1x64xf32, #tpu.memory_space<vmem>>, vector<1x1x64xf32>
    %48 = vector.shape_cast %47 : vector<1x1x64xf32> to vector<1x64xf32>
    %49 = vector.broadcast %48 : vector<1x64xf32> to vector<27x64xf32>
    %50 = arith.addf %46, %49 : vector<27x64xf32>
    %cst_55 = arith.constant 0.000000e+00 : f32
    %51 = vector.broadcast %cst_55 : f32 to vector<27x64xf32>
    %52 = arith.maximumf %50, %51 : vector<27x64xf32>
    %53 = vector.extract_strided_slice %52 {offsets = [0, 0], sizes = [10, 64], strides = [1, 1]} : vector<27x64xf32> to vector<10x64xf32>
    %c1_56 = arith.constant 1 : index
    %c0_57 = arith.constant 0 : index
    %54 = vector.load %arg15[%c1_56, %c0_57] : memref<12x64xf32, #tpu.memory_space<vmem>>, vector<10x64xf32>
    tpu.vector_store %arg15[%c1_56, %c0_57], %53 {strides = array<i32>} : memref<12x64xf32, #tpu.memory_space<vmem>>, vector<10x64xf32>,
    %c0_58 = arith.constant 0 : index
    %c0_59 = arith.constant 0 : index
    %55 = tpu.strided_load %arg15[%c0_58, %c0_59] {strides = array<i32: 2, 1>} : memref<12x64xf32, #tpu.memory_space<vmem>>, vector<6x64xf32>
    %c1_60 = arith.constant 1 : index
    %c0_61 = arith.constant 0 : index
    %56 = tpu.strided_load %arg15[%c1_60, %c0_61] {strides = array<i32: 2, 1>} : memref<12x64xf32, #tpu.memory_space<vmem>>, vector<6x64xf32>
    %57 = arith.maximumf %55, %56 : vector<6x64xf32>
    %58 = arith.truncf %57 : vector<6x64xf32> to vector<6x64xbf16>
    %c4_62 = arith.constant 4 : index
    %c0_63 = arith.constant 0 : index
    %59 = vector.load %arg18[%c4_62, %c0_63] : memref<28x64xbf16, #tpu.memory_space<vmem>>, vector<6x64xbf16>
    tpu.vector_store %arg18[%c4_62, %c0_63], %58 {strides = array<i32>} : memref<28x64xbf16, #tpu.memory_space<vmem>>, vector<6x64xbf16>,
    %60 = vector.extract_strided_slice %52 {offsets = [17, 0], sizes = [10, 64], strides = [1, 1]} : vector<27x64xf32> to vector<10x64xf32>
    %c1_64 = arith.constant 1 : index
    %c0_65 = arith.constant 0 : index
    %61 = vector.load %arg15[%c1_64, %c0_65] : memref<12x64xf32, #tpu.memory_space<vmem>>, vector<10x64xf32>
    tpu.vector_store %arg15[%c1_64, %c0_65], %60 {strides = array<i32>} : memref<12x64xf32, #tpu.memory_space<vmem>>, vector<10x64xf32>,
    %c0_66 = arith.constant 0 : index
    %c0_67 = arith.constant 0 : index
    %62 = tpu.strided_load %arg15[%c0_66, %c0_67] {strides = array<i32: 2, 1>} : memref<12x64xf32, #tpu.memory_space<vmem>>, vector<6x64xf32>
    %c1_68 = arith.constant 1 : index
    %c0_69 = arith.constant 0 : index
    %63 = tpu.strided_load %arg15[%c1_68, %c0_69] {strides = array<i32: 2, 1>} : memref<12x64xf32, #tpu.memory_space<vmem>>, vector<6x64xf32>
    %64 = arith.maximumf %62, %63 : vector<6x64xf32>
    %65 = arith.truncf %64 : vector<6x64xf32> to vector<6x64xbf16>
    %c18 = arith.constant 18 : index
    %c0_70 = arith.constant 0 : index
    %66 = vector.load %arg18[%c18, %c0_70] : memref<28x64xbf16, #tpu.memory_space<vmem>>, vector<6x64xbf16>
    tpu.vector_store %arg18[%c18, %c0_70], %65 {strides = array<i32>} : memref<28x64xbf16, #tpu.memory_space<vmem>>, vector<6x64xbf16>,
    %c0_71 = arith.constant 0 : index
    %c0_72 = arith.constant 0 : index
    %67 = vector.load %arg18[%c0_71, %c0_72] : memref<28x64xbf16, #tpu.memory_space<vmem>>, vector<21x64xbf16>
    %c1_73 = arith.constant 1 : index
    %c0_74 = arith.constant 0 : index
    %68 = vector.load %arg18[%c1_73, %c0_74] : memref<28x64xbf16, #tpu.memory_space<vmem>>, vector<21x64xbf16>
    %c2_75 = arith.constant 2 : index
    %c0_76 = arith.constant 0 : index
    %69 = vector.load %arg18[%c2_75, %c0_76] : memref<28x64xbf16, #tpu.memory_space<vmem>>, vector<21x64xbf16>
    %c3_77 = arith.constant 3 : index
    %c0_78 = arith.constant 0 : index
    %70 = vector.load %arg18[%c3_77, %c0_78] : memref<28x64xbf16, #tpu.memory_space<vmem>>, vector<21x64xbf16>
    %c4_79 = arith.constant 4 : index
    %c0_80 = arith.constant 0 : index
    %71 = vector.load %arg18[%c4_79, %c0_80] : memref<28x64xbf16, #tpu.memory_space<vmem>>, vector<21x64xbf16>
    %c5_81 = arith.constant 5 : index
    %c0_82 = arith.constant 0 : index
    %72 = vector.load %arg18[%c5_81, %c0_82] : memref<28x64xbf16, #tpu.memory_space<vmem>>, vector<21x64xbf16>
    %c6_83 = arith.constant 6 : index
    %c0_84 = arith.constant 0 : index
    %73 = vector.load %arg18[%c6_83, %c0_84] : memref<28x64xbf16, #tpu.memory_space<vmem>>, vector<21x64xbf16>
    %c7_85 = arith.constant 7 : index
    %c0_86 = arith.constant 0 : index
    %74 = vector.load %arg18[%c7_85, %c0_86] : memref<28x64xbf16, #tpu.memory_space<vmem>>, vector<21x64xbf16>
    %75 = tpu.concatenate %67, %68, %69, %70, %71, %72, %73, %74 in 1 : vector<21x64xbf16>, vector<21x64xbf16>, vector<21x64xbf16>, vector<21x64xbf16>, vector<21x64xbf16>, vector<21x64xbf16>, vector<21x64xbf16>, vector<21x64xbf16> -> vector<21x512xbf16>
    %c0_87 = arith.constant 0 : index
    %c0_88 = arith.constant 0 : index
    %c0_89 = arith.constant 0 : index
    %76 = vector.load %arg6[%c0_87, %c0_88, %c0_89] : memref<1x512x60xbf16, #tpu.memory_space<vmem>>, vector<1x512x60xbf16>
    %77 = vector.shape_cast %76 : vector<1x512x60xbf16> to vector<512x60xbf16>
    %cst_90 = arith.constant dense<0.000000e+00> : vector<21x60xf32>
    %78 = tpu.matmul %75, %77, %cst_90 {dimension_numbers = #tpu.dot_dimension_numbers<[1], [0], [0], [1], [0, 0, 1, 1], [], []>} : vector<21x512xbf16>, vector<512x60xbf16>, vector<21x60xf32> -> vector<21x60xf32>
    %c0_91 = arith.constant 0 : index
    %c0_92 = arith.constant 0 : index
    %c0_93 = arith.constant 0 : index
    %79 = vector.load %arg7[%c0_91, %c0_92, %c0_93] : memref<1x1x60xf32, #tpu.memory_space<vmem>>, vector<1x1x60xf32>
    %80 = vector.shape_cast %79 : vector<1x1x60xf32> to vector<1x60xf32>
    %81 = vector.broadcast %80 : vector<1x60xf32> to vector<21x60xf32>
    %82 = arith.addf %78, %81 : vector<21x60xf32>
    %cst_94 = arith.constant 0.000000e+00 : f32
    %83 = vector.broadcast %cst_94 : f32 to vector<21x60xf32>
    %84 = arith.maximumf %82, %83 : vector<21x60xf32>
    %85 = vector.extract_strided_slice %84 {offsets = [0, 0], sizes = [7, 60], strides = [1, 1]} : vector<21x60xf32> to vector<7x60xf32>
    %c1_95 = arith.constant 1 : index
    %c0_96 = arith.constant 0 : index
    %86 = vector.load %arg16[%c1_95, %c0_96] : memref<8x60xf32, #tpu.memory_space<vmem>>, vector<7x60xf32>
    tpu.vector_store %arg16[%c1_95, %c0_96], %85 {strides = array<i32>} : memref<8x60xf32, #tpu.memory_space<vmem>>, vector<7x60xf32>,
    %c0_97 = arith.constant 0 : index
    %c0_98 = arith.constant 0 : index
    %87 = tpu.strided_load %arg16[%c0_97, %c0_98] {strides = array<i32: 2, 1>} : memref<8x60xf32, #tpu.memory_space<vmem>>, vector<4x60xf32>
    %c1_99 = arith.constant 1 : index
    %c0_100 = arith.constant 0 : index
    %88 = tpu.strided_load %arg16[%c1_99, %c0_100] {strides = array<i32: 2, 1>} : memref<8x60xf32, #tpu.memory_space<vmem>>, vector<4x60xf32>
    %89 = arith.maximumf %87, %88 : vector<4x60xf32>
    %c0_101 = arith.constant 0 : index
    %c0_102 = arith.constant 0 : index
    %c0_103 = arith.constant 0 : index
    %c0_104 = arith.constant 0 : index
    %90 = vector.load %arg12[%c0_101, %c0_102, %c0_103, %c0_104] : memref<1x2x4x60xf32, #tpu.memory_space<vmem>>, vector<1x1x4x60xf32>
    %91 = vector.shape_cast %90 : vector<1x1x4x60xf32> to vector<4x60xf32>
    %92 = vector.shape_cast %89 : vector<4x60xf32> to vector<1x1x4x60xf32>
    tpu.vector_store %arg12[%c0_101, %c0_102, %c0_103, %c0_104], %92 {strides = array<i32>} : memref<1x2x4x60xf32, #tpu.memory_space<vmem>>, vector<1x1x4x60xf32>,
    %93 = vector.extract_strided_slice %84 {offsets = [14, 0], sizes = [7, 60], strides = [1, 1]} : vector<21x60xf32> to vector<7x60xf32>
    %c1_105 = arith.constant 1 : index
    %c0_106 = arith.constant 0 : index
    %94 = vector.load %arg16[%c1_105, %c0_106] : memref<8x60xf32, #tpu.memory_space<vmem>>, vector<7x60xf32>
    tpu.vector_store %arg16[%c1_105, %c0_106], %93 {strides = array<i32>} : memref<8x60xf32, #tpu.memory_space<vmem>>, vector<7x60xf32>,
    %c0_107 = arith.constant 0 : index
    %c0_108 = arith.constant 0 : index
    %95 = tpu.strided_load %arg16[%c0_107, %c0_108] {strides = array<i32: 2, 1>} : memref<8x60xf32, #tpu.memory_space<vmem>>, vector<4x60xf32>
    %c1_109 = arith.constant 1 : index
    %c0_110 = arith.constant 0 : index
    %96 = tpu.strided_load %arg16[%c1_109, %c0_110] {strides = array<i32: 2, 1>} : memref<8x60xf32, #tpu.memory_space<vmem>>, vector<4x60xf32>
    %97 = arith.maximumf %95, %96 : vector<4x60xf32>
    %c0_111 = arith.constant 0 : index
    %c1_112 = arith.constant 1 : index
    %c0_113 = arith.constant 0 : index
    %c0_114 = arith.constant 0 : index
    %98 = vector.load %arg12[%c0_111, %c1_112, %c0_113, %c0_114] : memref<1x2x4x60xf32, #tpu.memory_space<vmem>>, vector<1x1x4x60xf32>
    %99 = vector.shape_cast %98 : vector<1x1x4x60xf32> to vector<4x60xf32>
    %100 = vector.shape_cast %97 : vector<4x60xf32> to vector<1x1x4x60xf32>
    tpu.vector_store %arg12[%c0_111, %c1_112, %c0_113, %c0_114], %100 {strides = array<i32>} : memref<1x2x4x60xf32, #tpu.memory_space<vmem>>, vector<1x1x4x60xf32>,
    %c0_115 = arith.constant 0 : index
    %c0_116 = arith.constant 0 : index
    %c0_117 = arith.constant 0 : index
    %c0_118 = arith.constant 0 : index
    %101 = vector.load %arg12[%c0_115, %c0_116, %c0_117, %c0_118] : memref<1x2x4x60xf32, #tpu.memory_space<vmem>>, vector<1x2x4x60xf32>
    %102 = vector.shape_cast %101 : vector<1x2x4x60xf32> to vector<2x4x60xf32>
    %103 = arith.truncf %102 : vector<2x4x60xf32> to vector<2x4x60xbf16>
    %104 = vector.extract_strided_slice %103 {offsets = [0, 0, 0], sizes = [2, 1, 60], strides = [1, 1, 1]} : vector<2x4x60xbf16> to vector<2x1x60xbf16>
    %105 = vector.shape_cast %104 : vector<2x1x60xbf16> to vector<2x60xbf16>
    %c0_119 = arith.constant 0 : index
    %c0_120 = arith.constant 0 : index
    %c0_121 = arith.constant 0 : index
    %c0_122 = arith.constant 0 : index
    %106 = vector.load %arg8[%c0_119, %c0_120, %c0_121, %c0_122] : memref<1x4x60x256xbf16, #tpu.memory_space<vmem>>, vector<1x1x60x256xbf16>
    %107 = vector.shape_cast %106 : vector<1x1x60x256xbf16> to vector<60x256xbf16>
    %cst_123 = arith.constant dense<0.000000e+00> : vector<2x256xf32>
    %108 = tpu.matmul %105, %107, %cst_123 {dimension_numbers = #tpu.dot_dimension_numbers<[1], [0], [0], [1], [0, 0, 1, 1], [], []>} : vector<2x60xbf16>, vector<60x256xbf16>, vector<2x256xf32> -> vector<2x256xf32>
    %109 = vector.extract_strided_slice %103 {offsets = [0, 1, 0], sizes = [2, 1, 60], strides = [1, 1, 1]} : vector<2x4x60xbf16> to vector<2x1x60xbf16>
    %110 = vector.shape_cast %109 : vector<2x1x60xbf16> to vector<2x60xbf16>
    %c0_124 = arith.constant 0 : index
    %c1_125 = arith.constant 1 : index
    %c0_126 = arith.constant 0 : index
    %c0_127 = arith.constant 0 : index
    %111 = vector.load %arg8[%c0_124, %c1_125, %c0_126, %c0_127] : memref<1x4x60x256xbf16, #tpu.memory_space<vmem>>, vector<1x1x60x256xbf16>
    %112 = vector.shape_cast %111 : vector<1x1x60x256xbf16> to vector<60x256xbf16>
    %cst_128 = arith.constant dense<0.000000e+00> : vector<2x256xf32>
    %113 = tpu.matmul %110, %112, %cst_128 {dimension_numbers = #tpu.dot_dimension_numbers<[1], [0], [0], [1], [0, 0, 1, 1], [], []>} : vector<2x60xbf16>, vector<60x256xbf16>, vector<2x256xf32> -> vector<2x256xf32>
    %114 = arith.addf %108, %113 : vector<2x256xf32>
    %115 = vector.extract_strided_slice %103 {offsets = [0, 2, 0], sizes = [2, 1, 60], strides = [1, 1, 1]} : vector<2x4x60xbf16> to vector<2x1x60xbf16>
    %116 = vector.shape_cast %115 : vector<2x1x60xbf16> to vector<2x60xbf16>
    %c0_129 = arith.constant 0 : index
    %c2_130 = arith.constant 2 : index
    %c0_131 = arith.constant 0 : index
    %c0_132 = arith.constant 0 : index
    %117 = vector.load %arg8[%c0_129, %c2_130, %c0_131, %c0_132] : memref<1x4x60x256xbf16, #tpu.memory_space<vmem>>, vector<1x1x60x256xbf16>
    %118 = vector.shape_cast %117 : vector<1x1x60x256xbf16> to vector<60x256xbf16>
    %cst_133 = arith.constant dense<0.000000e+00> : vector<2x256xf32>
    %119 = tpu.matmul %116, %118, %cst_133 {dimension_numbers = #tpu.dot_dimension_numbers<[1], [0], [0], [1], [0, 0, 1, 1], [], []>} : vector<2x60xbf16>, vector<60x256xbf16>, vector<2x256xf32> -> vector<2x256xf32>
    %120 = arith.addf %114, %119 : vector<2x256xf32>
    %121 = vector.extract_strided_slice %103 {offsets = [0, 3, 0], sizes = [2, 1, 60], strides = [1, 1, 1]} : vector<2x4x60xbf16> to vector<2x1x60xbf16>
    %122 = vector.shape_cast %121 : vector<2x1x60xbf16> to vector<2x60xbf16>
    %c0_134 = arith.constant 0 : index
    %c3_135 = arith.constant 3 : index
    %c0_136 = arith.constant 0 : index
    %c0_137 = arith.constant 0 : index
    %123 = vector.load %arg8[%c0_134, %c3_135, %c0_136, %c0_137] : memref<1x4x60x256xbf16, #tpu.memory_space<vmem>>, vector<1x1x60x256xbf16>
    %124 = vector.shape_cast %123 : vector<1x1x60x256xbf16> to vector<60x256xbf16>
    %cst_138 = arith.constant dense<0.000000e+00> : vector<2x256xf32>
    %125 = tpu.matmul %122, %124, %cst_138 {dimension_numbers = #tpu.dot_dimension_numbers<[1], [0], [0], [1], [0, 0, 1, 1], [], []>} : vector<2x60xbf16>, vector<60x256xbf16>, vector<2x256xf32> -> vector<2x256xf32>
    %126 = arith.addf %120, %125 : vector<2x256xf32>
    %c0_139 = arith.constant 0 : index
    %c0_140 = arith.constant 0 : index
    %c0_141 = arith.constant 0 : index
    %127 = vector.load %arg9[%c0_139, %c0_140, %c0_141] : memref<1x1x256xf32, #tpu.memory_space<vmem>>, vector<1x1x256xf32>
    %128 = vector.shape_cast %127 : vector<1x1x256xf32> to vector<1x256xf32>
    %129 = vector.broadcast %128 : vector<1x256xf32> to vector<2x256xf32>
    %130 = arith.addf %126, %129 : vector<2x256xf32>
    %cst_142 = arith.constant 0.000000e+00 : f32
    %131 = vector.broadcast %cst_142 : f32 to vector<2x256xf32>
    %132 = arith.maximumf %130, %131 : vector<2x256xf32>
    %133 = arith.truncf %132 : vector<2x256xf32> to vector<2x256xbf16>
    %c0_143 = arith.constant 0 : index
    %c0_144 = arith.constant 0 : index
    %c0_145 = arith.constant 0 : index
    %134 = vector.load %arg10[%c0_143, %c0_144, %c0_145] : memref<1x256x128xbf16, #tpu.memory_space<vmem>>, vector<1x256x128xbf16>
    %135 = vector.shape_cast %134 : vector<1x256x128xbf16> to vector<256x128xbf16>
    %cst_146 = arith.constant dense<0.000000e+00> : vector<2x128xf32>
    %136 = tpu.matmul %133, %135, %cst_146 {dimension_numbers = #tpu.dot_dimension_numbers<[1], [0], [0], [1], [0, 0, 1, 1], [], []>} : vector<2x256xbf16>, vector<256x128xbf16>, vector<2x128xf32> -> vector<2x128xf32>
    %c0_147 = arith.constant 0 : index
    %c0_148 = arith.constant 0 : index
    %c0_149 = arith.constant 0 : index
    %137 = vector.load %arg11[%c0_147, %c0_148, %c0_149] : memref<1x1x128xf32, #tpu.memory_space<vmem>>, vector<1x1x128xf32>
    %138 = vector.shape_cast %137 : vector<1x1x128xf32> to vector<1x128xf32>
    %139 = vector.broadcast %138 : vector<1x128xf32> to vector<2x128xf32>
    %140 = arith.addf %136, %139 : vector<2x128xf32>
    %c0_150 = arith.constant 0 : index
    %c0_151 = arith.constant 0 : index
    %c0_152 = arith.constant 0 : index
    %141 = vector.load %arg13[%c0_150, %c0_151, %c0_152] : memref<1x2x128xf32, #tpu.memory_space<vmem>>, vector<1x2x128xf32>
    %142 = vector.shape_cast %141 : vector<1x2x128xf32> to vector<2x128xf32>
    %143 = vector.shape_cast %140 : vector<2x128xf32> to vector<1x2x128xf32>
    tpu.vector_store %arg13[%c0_150, %c0_151, %c0_152], %143 {strides = array<i32>} : memref<1x2x128xf32, #tpu.memory_space<vmem>>, vector<1x2x128xf32>,
    return
  }
  func.func @transform_0(%arg0: i32) -> (i32, i32, i32) {
    %c0_i32 = arith.constant 0 : i32
    %c0_i32_0 = arith.constant 0 : i32
    %c0_i32_1 = arith.constant 0 : i32
    return %arg0, %c0_i32, %c0_i32_0 : i32, i32, i32
  }
  func.func @transform_1(%arg0: i32) -> (i32, i32, i32) {
    %c0_i32 = arith.constant 0 : i32
    %c0_i32_0 = arith.constant 0 : i32
    %c0_i32_1 = arith.constant 0 : i32
    return %arg0, %c0_i32, %c0_i32_0 : i32, i32, i32
  }
  func.func @transform_2(%arg0: i32) -> (i32, i32, i32) {
    %c0_i32 = arith.constant 0 : i32
    %c0_i32_0 = arith.constant 0 : i32
    %c0_i32_1 = arith.constant 0 : i32
    return %arg0, %c0_i32, %c0_i32_0 : i32, i32, i32
  }
  func.func @transform_3(%arg0: i32) -> (i32, i32, i32) {
    %c0_i32 = arith.constant 0 : i32
    %c0_i32_0 = arith.constant 0 : i32
    %c0_i32_1 = arith.constant 0 : i32
    return %arg0, %c0_i32, %c0_i32_0 : i32, i32, i32
  }
  func.func @transform_4(%arg0: i32) -> (i32, i32, i32) {
    %c0_i32 = arith.constant 0 : i32
    %c0_i32_0 = arith.constant 0 : i32
    %c0_i32_1 = arith.constant 0 : i32
    return %arg0, %c0_i32, %c0_i32_0 : i32, i32, i32
  }
  func.func @transform_5(%arg0: i32) -> (i32, i32, i32) {
    %c0_i32 = arith.constant 0 : i32
    %c0_i32_0 = arith.constant 0 : i32
    %c0_i32_1 = arith.constant 0 : i32
    return %arg0, %c0_i32, %c0_i32_0 : i32, i32, i32
  }
  func.func @transform_6(%arg0: i32) -> (i32, i32, i32) {
    %c0_i32 = arith.constant 0 : i32
    %c0_i32_0 = arith.constant 0 : i32
    %c0_i32_1 = arith.constant 0 : i32
    return %arg0, %c0_i32, %c0_i32_0 : i32, i32, i32
  }
  func.func @transform_7(%arg0: i32) -> (i32, i32, i32, i32) {
    %c0_i32 = arith.constant 0 : i32
    %c0_i32_0 = arith.constant 0 : i32
    %c0_i32_1 = arith.constant 0 : i32
    %c0_i32_2 = arith.constant 0 : i32
    return %arg0, %c0_i32, %c0_i32_0, %c0_i32_1 : i32, i32, i32, i32
  }
  func.func @transform_8(%arg0: i32) -> (i32, i32, i32) {
    %c0_i32 = arith.constant 0 : i32
    %c0_i32_0 = arith.constant 0 : i32
    %c0_i32_1 = arith.constant 0 : i32
    return %arg0, %c0_i32, %c0_i32_0 : i32, i32, i32
  }
  func.func @transform_9(%arg0: i32) -> (i32, i32, i32) {
    %c0_i32 = arith.constant 0 : i32
    %c0_i32_0 = arith.constant 0 : i32
    %c0_i32_1 = arith.constant 0 : i32
    return %arg0, %c0_i32, %c0_i32_0 : i32, i32, i32
  }
  func.func @transform_10(%arg0: i32) -> (i32, i32, i32) {
    %c0_i32 = arith.constant 0 : i32
    %c0_i32_0 = arith.constant 0 : i32
    %c0_i32_1 = arith.constant 0 : i32
    return %arg0, %c0_i32, %c0_i32_0 : i32, i32, i32
  }
  func.func @transform_11(%arg0: i32) -> (i32, i32, i32, i32) {
    %c0_i32 = arith.constant 0 : i32
    %c0_i32_0 = arith.constant 0 : i32
    %c0_i32_1 = arith.constant 0 : i32
    %c0_i32_2 = arith.constant 0 : i32
    return %arg0, %c0_i32, %c0_i32_0, %c0_i32_1 : i32, i32, i32, i32
  }
  func.func @transform_12(%arg0: i32) -> (i32, i32, i32) {
    %c0_i32 = arith.constant 0 : i32
    %c0_i32_0 = arith.constant 0 : i32
    %c0_i32_1 = arith.constant 0 : i32
    return %arg0, %c0_i32, %c0_i32_0 : i32, i32, i32
  }
}

</mosaic_0001>

<bundles_post_ra>
// kernel: squeeze.4
= control target key start
LH: loop header
LB: loop body
LE: loop exit
PB: predicated region body
PF: predicated region fallthrough
CT: control target
= control target key end

     0   :  { %vm6_vm0 = vcmask 1041409   ;;  %s801_s14 = smov 124   ;;  %s802_s15 = smov 116   ;;  %vm10_vm1 = vcmask 1042434   ;;  %vm14_vm2 = vcmask 1043459   ;;  %s1298_s0 = inlined_call_operand.vmem [shape: f32[1,2,60,4], index: 0, kind: input, shape index: {}]   ;;  %s1299_s1 = inlined_call_operand.hbm [shape: f32[2,240], index: 1, kind: output, shape index: {}]  }
   0x1   :  { %v627_v0 = vld [vmem:[%s1298_s0 + $0x1f] sm:$0x1]   ;;  %v631_v3 = vld [vmem:[%s1298_s0 + $0x1d] sm:$0x1]   ;;  %v629_v6 = vld [vmem:[%s1298_s0 + $0x1e] sm:$0x1]  }
   0x2   :  { %v628_v1 = vld [vmem:[%s1298_s0 + $0x5e] sm:$0x2]   ;;  %v632_v4 = vld [vmem:[%s1298_s0 + $0x5c] sm:$0x2]   ;;  %v630_v7 = vld [vmem:[%s1298_s0 + $0x5d] sm:$0x2]  }
   0x3   :  { %v25_v2 = vsel %vm6_vm0, %v628_v1, %v627_v0  ;;  %v45_v5 = vsel %vm6_vm0, %v632_v4, %v631_v3  ;;  %v633_v8 = vld [vmem:[%s1298_s0 + $0x1c] sm:$0x1]   ;;  %v643_v10 = vld [vmem:[%s1298_s0 + $0x19] sm:$0x1]   ;;  %v35_v12 = vsel %vm6_vm0, %v630_v7, %v629_v6  ;;  %v647_v13 = vld [vmem:[%s1298_s0 + $0x18] sm:$0x1]  }
   0x4   :  { %26 = vrot.lane.b32.xlu0 %v25_v2, %s801_s14  ;;  %46 = vrot.lane.b32.xlu1 %v45_v5, %s802_s15  ;;  %v634_v9 = vld [vmem:[%s1298_s0 + $0x5b] sm:$0x2]   ;;  %v644_v11 = vld [vmem:[%s1298_s0 + $0x58] sm:$0x2]   ;;  %s803_s7 = smov 120   ;;  %s804_s14 = smov 112  }
   0x5   :  { %v648_v14 = vld [vmem:[%s1298_s0 + $0x57] sm:$0x2]   ;;  %v55_v15 = vsel %vm6_vm0, %v634_v9, %v633_v8  ;;  %v105_v16 = vsel %vm6_vm0, %v644_v11, %v643_v10  ;;  %v645_v17 = vld [vmem:[%s1298_s0 + $0x37] sm:$0x4]   ;;  %v635_v20 = vld [vmem:[%s1298_s0 + $0x1b] sm:$0x1]  }
   0x6   :  { %v649_v18 = vld [vmem:[%s1298_s0 + $0x36] sm:$0x4]   ;;  %v125_v19 = vsel %vm6_vm0, %v648_v14, %v647_v13  ;;  %v636_v21 = vld [vmem:[%s1298_s0 + $0x5a] sm:$0x2]   ;;  %v109_v25 = vsel %vm10_vm1, %v645_v17, %v105_v16  ;;  %v646_v26 = vld [vmem:[%s1298_s0 + $0x76] sm:$0x8]  }
   0x7   :  { %v637_v22 = vld [vmem:[%s1298_s0 + $0x39] sm:$0x4]   ;;  %v65_v23 = vsel %vm6_vm0, %v636_v21, %v635_v20  ;;  %v129_v28 = vsel %vm10_vm1, %v649_v18, %v125_v19  ;;  %v650_v29 = vld [vmem:[%s1298_s0 + $0x75] sm:$0x8]   ;;  %v655_v30 = vld [vmem:[%s1298_s0 + $0x16] sm:$0x1]   ;;  %v113_v35 = vsel %vm14_vm2, %v646_v26, %v109_v25 }
   0x8   :  { %v638_v24 = vld [vmem:[%s1298_s0 + $0x78] sm:$0x8]   ;;  %v69_v27 = vsel %vm10_vm1, %v637_v22, %v65_v23  ;;  %v656_v32 = vld [vmem:[%s1298_s0 + $0x55] sm:$0x2]   ;;  %s805_s25 = smov 108   ;;  %v133_v40 = vsel %vm14_vm2, %v650_v29, %v129_v28  ;;  %s806_s11 = smov 100  }
   0x9   :  { %v73_v31 = vsel %vm14_vm2, %v638_v24, %v69_v27  ;;  %v639_v33 = vld [vmem:[%s1298_s0 + $0x1a] sm:$0x1]   ;;  %v659_v36 = vld [vmem:[%s1298_s0 + $0x15] sm:$0x1]   ;;  %v165_v43 = vsel %vm6_vm0, %v656_v32, %v655_v30  ;;  %v657_v44 = vld [vmem:[%s1298_s0 + $0x34] sm:$0x4]  }
   0xa   :  { %74 = vrot.lane.b32.xlu2 %v73_v31, %s805_s25  ;;  %v640_v34 = vld [vmem:[%s1298_s0 + $0x59] sm:$0x2]   ;;  %v660_v37 = vld [vmem:[%s1298_s0 + $0x54] sm:$0x2]   ;;  %v651_v48 = vld [vmem:[%s1298_s0 + $0x17] sm:$0x1]   ;;  %v169_v50 = vsel %vm10_vm1, %v657_v44, %v165_v43 }
   0xb   :  { %v85_v38 = vsel %vm6_vm0, %v640_v34, %v639_v33  ;;  %v641_v39 = vld [vmem:[%s1298_s0 + $0x38] sm:$0x4]   ;;  %v185_v45 = vsel %vm6_vm0, %v660_v37, %v659_v36  ;;  %v661_v46 = vld [vmem:[%s1298_s0 + $0x33] sm:$0x4]   ;;  %v652_v49 = vld [vmem:[%s1298_s0 + $0x56] sm:$0x2]  }
   0xc   :  { %36 = vrot.lane.b32.xlu0 %v35_v12, %s803_s7  ;;  %56 = vrot.lane.b32.xlu1 %v55_v15, %s804_s14  ;;  %v89_v41 = vsel %vm10_vm1, %v641_v39, %v85_v38  ;;  %v642_v42 = vld [vmem:[%s1298_s0 + $0x77] sm:$0x8]   ;;  %s807_s14 = smov 96   ;;  %v658_v51 = vld [vmem:[%s1298_s0 + $0x73] sm:$0x8]   ;;  %v189_v52 = vsel %vm10_vm1, %v661_v46, %v185_v45  ;;  %v145_v54 = vsel %vm6_vm0, %v652_v49, %v651_v48  ;;  %s808_s29 = smov 104  }
   0xd   :  { %v93_v47 = vsel %vm14_vm2, %v642_v42, %v89_v41  ;;  %v662_v53 = vld [vmem:[%s1298_s0 + $0x72] sm:$0x8]   ;;  %v653_v55 = vld [vmem:[%s1298_s0 + $0x35] sm:$0x4]   ;;  %v667_v56 = vld [vmem:[%s1298_s0 + $0x13] sm:$0x1]   ;;  %v173_v58 = vsel %vm14_vm2, %v658_v51, %v169_v50 }
   0xe   :  { %v668_v57 = vld [vmem:[%s1298_s0 + $0x52] sm:$0x2]   ;;  %v671_v59 = vld [vmem:[%s1298_s0 + $0x12] sm:$0x1]   ;;  %v193_v61 = vsel %vm14_vm2, %v662_v53, %v189_v52  ;;  %v149_v62 = vsel %vm10_vm1, %v653_v55, %v145_v54  ;;  %v654_v63 = vld [vmem:[%s1298_s0 + $0x74] sm:$0x8]  }
   0xf   :  { %v672_v60 = vld [vmem:[%s1298_s0 + $0x51] sm:$0x2]   ;;  %v225_v0 = vsel %vm6_vm0, %v668_v57, %v667_v56  ;;  %v669_v1 = vld [vmem:[%s1298_s0 + $0x31] sm:$0x4]   ;;  %s809_s9 = smov 88   ;;  %s810_s16 = smov 84   ;;  %v153_v6 = vsel %vm14_vm2, %v654_v63, %v149_v62 }
  0x10   :  { %v245_v2 = vsel %vm6_vm0, %v672_v60, %v671_v59  ;;  %v673_v3 = vld [vmem:[%s1298_s0 + $0x30] sm:$0x4]   ;;  %v663_v4 = vld [vmem:[%s1298_s0 + $0x14] sm:$0x1]   ;;  %v229_v7 = vsel %vm10_vm1, %v669_v1, %v225_v0  ;;  %v670_v8 = vld [vmem:[%s1298_s0 + $0x70] sm:$0x8]  }
  0x11   :  { %v664_v5 = vld [vmem:[%s1298_s0 + $0x53] sm:$0x2]   ;;  %v249_v9 = vsel %vm10_vm1, %v673_v3, %v245_v2  ;;  %v674_v10 = vld [vmem:[%s1298_s0 + $0x6f] sm:$0x8]   ;;  %v679_v13 = vld [vmem:[%s1298_s0 + $0x10] sm:$0x1]   ;;  %v233_v15 = vsel %vm14_vm2, %v670_v8, %v229_v7 }
  0x12   :  { %94 = vrot.lane.b32.xlu2 %v93_v47, %s808_s29  ;;  %v205_v11 = vsel %vm6_vm0, %v664_v5, %v663_v4  ;;  %v665_v12 = vld [vmem:[%s1298_s0 + $0x32] sm:$0x4]   ;;  %v680_v14 = vld [vmem:[%s1298_s0 + $0x4f] sm:$0x2]   ;;  %s811_s27 = smov 92  }
  0x13   :  { %v683_v16 = vld [vmem:[%s1298_s0 + $0xf] sm:$0x1]  }
  0x14   :  { %114 = vrot.lane.b32.xlu0 %v113_v35, %s806_s11  ;;  %134 = vrot.lane.b32.xlu1 %v133_v40, %s807_s14  ;;  %v684_v17 = vld [vmem:[%s1298_s0 + $0x4e] sm:$0x2]  }
  0x1a   :  { %154 = vrot.lane.b32.xlu2 %v153_v6, %s811_s27 }
  0x1c   :  { %174 = vrot.lane.b32.xlu0 %v173_v58, %s809_s9  ;;  %194 = vrot.lane.b32.xlu1 %v193_v61, %s810_s16 }
  0x1d   :  { %2 = vsyncpa [#allocation1], 0  ;;  %v253_v18 = vsel %vm14_vm2, %v674_v10, %v249_v9  ;;  %v209_v19 = vsel %vm10_vm1, %v665_v12, %v205_v11  ;;  %v666_v20 = vld [vmem:[%s1298_s0 + $0x71] sm:$0x8]   ;;  %v285_v21 = vsel %vm6_vm0, %v680_v14, %v679_v13  ;;  %v681_v22 = vld [vmem:[%s1298_s0 + $0x2e] sm:$0x4]   ;;  %v305_v23 = vsel %vm6_vm0, %v684_v17, %v683_v16 }
  0x1e   :  { %s812_s7 = smov 76   ;;  %v685_v24 = vld [vmem:[%s1298_s0 + $0x2d] sm:$0x4]   ;;  %v675_v25 = vld [vmem:[%s1298_s0 + $0x11] sm:$0x1]   ;;  %s813_s14 = smov 72   ;;  %v213_v27 = vsel %vm14_vm2, %v666_v20, %v209_v19  ;;  %v289_v28 = vsel %vm10_vm1, %v681_v22, %v285_v21 }
  0x1f   :  { %v676_v26 = vld [vmem:[%s1298_s0 + $0x50] sm:$0x2]   ;;  %v682_v29 = vld [vmem:[%s1298_s0 + $0x6d] sm:$0x8]   ;;  %v309_v30 = vsel %vm10_vm1, %v685_v24, %v305_v23  ;;  %v686_v31 = vld [vmem:[%s1298_s0 + $0x6c] sm:$0x8]  }
  0x20   :  { %v265_v32 = vsel %vm6_vm0, %v676_v26, %v675_v25  ;;  %v677_v33 = vld [vmem:[%s1298_s0 + $0x2f] sm:$0x4]   ;;  %v691_v34 = vld [vmem:[%s1298_s0 + $0xd] sm:$0x1]   ;;  %s814_s25 = smov 80   ;;  %v293_v36 = vsel %vm14_vm2, %v682_v29, %v289_v28  ;;  %v313_v39 = vsel %vm14_vm2, %v686_v31, %v309_v30  ;;  %s815_s5 = smov 64  }
  0x21   :  { %v692_v35 = vld [vmem:[%s1298_s0 + $0x4c] sm:$0x2]   ;;  %v695_v37 = vld [vmem:[%s1298_s0 + $0xc] sm:$0x1]   ;;  %v269_v40 = vsel %vm10_vm1, %v677_v33, %v265_v32  ;;  %v678_v41 = vld [vmem:[%s1298_s0 + $0x6e] sm:$0x8]  }
  0x22   :  { %214 = vrot.lane.b32.xlu2 %v213_v27, %s814_s25  ;;  %v696_v38 = vld [vmem:[%s1298_s0 + $0x4b] sm:$0x2]   ;;  %v345_v42 = vsel %vm6_vm0, %v692_v35, %v691_v34  ;;  %v693_v43 = vld [vmem:[%s1298_s0 + $0x2b] sm:$0x4]   ;;  %v687_v46 = vld [vmem:[%s1298_s0 + $0xe] sm:$0x1]   ;;  %v273_v48 = vsel %vm14_vm2, %v678_v41, %v269_v40 }
  0x23   :  { %v365_v44 = vsel %vm6_vm0, %v696_v38, %v695_v37  ;;  %v697_v45 = vld [vmem:[%s1298_s0 + $0x2a] sm:$0x4]   ;;  %v688_v47 = vld [vmem:[%s1298_s0 + $0x4d] sm:$0x2]   ;;  %s816_s12 = smov 60   ;;  %v349_v49 = vsel %vm10_vm1, %v693_v43, %v345_v42  ;;  %s817_s23 = smov 68  }
  0x24   :  { %234 = vrot.lane.b32.xlu0 %v233_v15, %s812_s7  ;;  %254 = vrot.lane.b32.xlu1 %v253_v18, %s813_s14  ;;  %v694_v50 = vld [vmem:[%s1298_s0 + $0x6a] sm:$0x8]   ;;  %v369_v51 = vsel %vm10_vm1, %v697_v45, %v365_v44  ;;  %v698_v52 = vld [vmem:[%s1298_s0 + $0x69] sm:$0x8]   ;;  %v325_v53 = vsel %vm6_vm0, %v688_v47, %v687_v46  ;;  %s818_s3 = smov 52   ;;  %s819_s10 = smov 48  }
  0x25   :  { %v689_v54 = vld [vmem:[%s1298_s0 + $0x2c] sm:$0x4]   ;;  %v703_v55 = vld [vmem:[%s1298_s0 + $0xa] sm:$0x1]   ;;  %v353_v57 = vsel %vm14_vm2, %v694_v50, %v349_v49  ;;  %v707_v58 = vld [vmem:[%s1298_s0 + $0x9] sm:$0x1]   ;;  %v373_v60 = vsel %vm14_vm2, %v698_v52, %v369_v51 }
  0x26   :  { %v704_v56 = vld [vmem:[%s1298_s0 + $0x49] sm:$0x2]   ;;  %v708_v59 = vld [vmem:[%s1298_s0 + $0x48] sm:$0x2]   ;;  %v329_v61 = vsel %vm10_vm1, %v689_v54, %v325_v53  ;;  %v690_v62 = vld [vmem:[%s1298_s0 + $0x6b] sm:$0x8]  }
  0x27   :  { %v405_v63 = vsel %vm6_vm0, %v704_v56, %v703_v55  ;;  %v705_v0 = vld [vmem:[%s1298_s0 + $0x28] sm:$0x4]   ;;  %v425_v1 = vsel %vm6_vm0, %v708_v59, %v707_v58  ;;  %v709_v2 = vld [vmem:[%s1298_s0 + $0x27] sm:$0x4]   ;;  %v699_v3 = vld [vmem:[%s1298_s0 + $0xb] sm:$0x1]   ;;  %v333_v5 = vsel %vm14_vm2, %v690_v62, %v329_v61 }
  0x28   :  { %v700_v4 = vld [vmem:[%s1298_s0 + $0x4a] sm:$0x2]   ;;  %v409_v6 = vsel %vm10_vm1, %v705_v0, %v405_v63  ;;  %v706_v7 = vld [vmem:[%s1298_s0 + $0x67] sm:$0x8]   ;;  %v429_v8 = vsel %vm10_vm1, %v709_v2, %v425_v1  ;;  %v710_v9 = vld [vmem:[%s1298_s0 + $0x66] sm:$0x8]  }
  0x29   :  { %v385_v10 = vsel %vm6_vm0, %v700_v4, %v699_v3  ;;  %v701_v11 = vld [vmem:[%s1298_s0 + $0x29] sm:$0x4]   ;;  %v715_v12 = vld [vmem:[%s1298_s0 + $0x7] sm:$0x1]   ;;  %s820_s21 = smov 56   ;;  %v413_v14 = vsel %vm14_vm2, %v706_v7, %v409_v6  ;;  %v433_v17 = vsel %vm14_vm2, %v710_v9, %v429_v8  ;;  %s821_s30 = smov 40  }
  0x2a   :  { %274 = vrot.lane.b32.xlu2 %v273_v48, %s817_s23  ;;  %v716_v13 = vld [vmem:[%s1298_s0 + $0x46] sm:$0x2]   ;;  %v719_v15 = vld [vmem:[%s1298_s0 + $0x6] sm:$0x1]   ;;  %v389_v18 = vsel %vm10_vm1, %v701_v11, %v385_v10  ;;  %v702_v19 = vld [vmem:[%s1298_s0 + $0x68] sm:$0x8]  }
  0x2b   :  { %v720_v16 = vld [vmem:[%s1298_s0 + $0x45] sm:$0x2]   ;;  %v465_v20 = vsel %vm6_vm0, %v716_v13, %v715_v12  ;;  %v717_v21 = vld [vmem:[%s1298_s0 + $0x25] sm:$0x4]   ;;  %v711_v24 = vld [vmem:[%s1298_s0 + $0x8] sm:$0x1]   ;;  %v393_v26 = vsel %vm14_vm2, %v702_v19, %v389_v18 }
  0x2c   :  { %294 = vrot.lane.b32.xlu0 %v293_v36, %s815_s5  ;;  %314 = vrot.lane.b32.xlu1 %v313_v39, %s816_s12  ;;  %v485_v22 = vsel %vm6_vm0, %v720_v16, %v719_v15  ;;  %v721_v23 = vld [vmem:[%s1298_s0 + $0x24] sm:$0x4]   ;;  %v712_v25 = vld [vmem:[%s1298_s0 + $0x47] sm:$0x2]   ;;  %s822_s8 = smov 36   ;;  %v469_v27 = vsel %vm10_vm1, %v717_v21, %v465_v20  ;;  %s823_s19 = smov 44  }
  0x2d   :  { %v718_v28 = vld [vmem:[%s1298_s0 + $0x64] sm:$0x8]   ;;  %v489_v29 = vsel %vm10_vm1, %v721_v23, %v485_v22  ;;  %v722_v30 = vld [vmem:[%s1298_s0 + $0x63] sm:$0x8]   ;;  %v445_v31 = vsel %vm6_vm0, %v712_v25, %v711_v24  ;;  %v713_v32 = vld [vmem:[%s1298_s0 + $0x26] sm:$0x4]  }
  0x2e   :  { %v727_v33 = vld [vmem:[%s1298_s0 + $0x4] sm:$0x1]   ;;  %v473_v35 = vsel %vm14_vm2, %v718_v28, %v469_v27  ;;  %v731_v36 = vld [vmem:[%s1298_s0 + $0x3] sm:$0x1]   ;;  %v493_v38 = vsel %vm14_vm2, %v722_v30, %v489_v29  ;;  %v449_v39 = vsel %vm10_vm1, %v713_v32, %v445_v31  ;;  %v714_v40 = vld [vmem:[%s1298_s0 + $0x65] sm:$0x8]  }
  0x2f   :  { %v728_v34 = vld [vmem:[%s1298_s0 + $0x43] sm:$0x2]   ;;  %v732_v37 = vld [vmem:[%s1298_s0 + $0x42] sm:$0x2]   ;;  %s824_s28 = smov 28   ;;  %s825_s6 = smov 24   ;;  %v453_v47 = vsel %vm14_vm2, %v714_v40, %v449_v39 }
  0x30   :  { %v525_v41 = vsel %vm6_vm0, %v728_v34, %v727_v33  ;;  %v729_v42 = vld [vmem:[%s1298_s0 + $0x22] sm:$0x4]   ;;  %v545_v43 = vsel %vm6_vm0, %v732_v37, %v731_v36  ;;  %v733_v44 = vld [vmem:[%s1298_s0 + $0x21] sm:$0x4]   ;;  %v723_v45 = vld [vmem:[%s1298_s0 + $0x5] sm:$0x1]  }
  0x31   :  { %v724_v46 = vld [vmem:[%s1298_s0 + $0x44] sm:$0x2]   ;;  %v529_v48 = vsel %vm10_vm1, %v729_v42, %v525_v41  ;;  %v730_v49 = vld [vmem:[%s1298_s0 + $0x61] sm:$0x8]   ;;  %v549_v50 = vsel %vm10_vm1, %v733_v44, %v545_v43  ;;  %v734_v51 = vld [vmem:[%s1298_s0 + $0x60] sm:$0x8]  }
  0x32   :  { %334 = vrot.lane.b32.xlu2 %v333_v5, %s820_s21  ;;  %v505_v52 = vsel %vm6_vm0, %v724_v46, %v723_v45  ;;  %v725_v53 = vld [vmem:[%s1298_s0 + $0x23] sm:$0x4]   ;;  %v739_v54 = vld [vmem:[%s1298_s0 + $0x1] sm:$0x1]   ;;  %s826_s17 = smov 32   ;;  %v533_v56 = vsel %vm14_vm2, %v730_v49, %v529_v48  ;;  %s827_s22 = smov 16  }
  0x33   :  { %v740_v55 = vld [vmem:[%s1298_s0 + $0x40] sm:$0x2]   ;;  %v509_v58 = vsel %vm10_vm1, %v725_v53, %v505_v52  ;;  %v726_v59 = vld [vmem:[%s1298_s0 + $0x62] sm:$0x8]   ;;  %v735_v62 = vld [vmem:[%s1298_s0 + $0x2] sm:$0x1]  }
  0x34   :  { %354 = vrot.lane.b32.xlu0 %v353_v57, %s818_s3  ;;  %374 = vrot.lane.b32.xlu1 %v373_v60, %s819_s10  ;;  %v553_v57 = vsel %vm14_vm2, %v734_v51, %v549_v50  ;;  %v585_v60 = vsel %vm6_vm0, %v740_v55, %v739_v54  ;;  %v741_v61 = vld [vmem:[%s1298_s0 + $0x1f] sm:$0x4]   ;;  %v736_v63 = vld [vmem:[%s1298_s0 + $0x41] sm:$0x2]   ;;  %s828_s27 = smov 12   ;;  %v513_v0 = vsel %vm14_vm2, %v726_v59, %v509_v58  ;;  %s829_s3 = smov 20  }
  0x35   :  { %v589_v1 = vsel %vm10_vm1, %v741_v61, %v585_v60  ;;  %v742_v2 = vld [vmem:[%s1298_s0 + $0x5e] sm:$0x8]   ;;  %v565_v3 = vsel %vm6_vm0, %v736_v63, %v735_v62  ;;  %v737_v4 = vld [vmem:[%s1298_s0 + $0x20] sm:$0x4]   ;;  %v625_v7 = vld [vmem:[%s1298_s0 + $0x3e] sm:$0x4]  }
  0x36   :  { %v593_v5 = vsel %vm14_vm2, %v742_v2, %v589_v1  ;;  %v738_v6 = vld [vmem:[%s1298_s0 + $0x5f] sm:$0x8]   ;;  %v569_v8 = vsel %vm10_vm1, %v737_v4, %v565_v3  ;;  %v626_v9 = vld [vmem:[%s1298_s0 + $0x5d] sm:$0x8]   ;;  %vm16_vm3 = vcmask 31744   ;;  %s831_s14 = smov 8  }
  0x37   :  { %v3_v10 = vld [vmem:[%s1298_s0] sm:$0x1]   ;;  %vm76_vm4 = vcmask 917344   ;;  %vm96_vm5 = vcmask 884544   ;;  %vm28_vm6 = vcmask 1048544   ;;  %vm38_vm7 = vcmask 1015744  }
  0x38   :  { %v624_v11 = vld [vmem:[%s1298_s0 + $0x1f] sm:$0x2]   ;;  %s830_s0 = smov 4   ;;  %vm48_vm8 = vcmask 982944   ;;  %vm58_vm9 = vcmask 950144   ;;  %vm116_vm10 = vcmask 851744  }
  0x39   :  { %v7_v12 = vsel %vm6_vm0, %v624_v11, %v3_v10  ;;  %vm136_vm11 = vcmask 818944   ;;  %vm156_vm12 = vcmask 786144   ;;  %vm176_vm13 = vcmask 753344   ;;  %s832_s15 = smov [#allocation0]   ;;  %s617_s1 = sshll.u32 %s1299_s1, 4  ;;  %s618_s1 = int_to_ptr.hbm [resolvable:$true] %s617_s1 }
  0x3a   :  { %394 = vrot.lane.b32.xlu2 %v393_v26, %s823_s19  ;;  %v11_v13 = vsel %vm10_vm1, %v625_v7, %v7_v12  ;;  %vm196_vm14 = vcmask 720544   ;;  %vm216_vm15 = vcmask 687744   ;;  %vm236_vm0 = vcmask 654944   ;;  %s615_s16 = sshll.u32 %s832_s15, 4  ;;  %s616_s16 = int_to_ptr.vmem [resolvable:$true] %s615_s16 }
  0x3b   :  { %v15_v15 = vsel %vm14_vm2, %v626_v9, %v11_v13  ;;  %vm256_vm1 = vcmask 622144  }
  0x3c   :  { %414 = vrot.lane.b32.xlu0 %v413_v14, %s821_s30  ;;  %434 = vrot.lane.b32.xlu1 %v433_v17, %s822_s8  ;;  %v573_v14 = vsel %vm14_vm2, %v738_v6, %v569_v8  ;;  %17 = vst.msk [vmem:[#allocation2] ss:$8 sm:$0x3] %vm16_vm3, %v15_v15   ;;  %vm276_vm2 = vcmask 589344  }
  0x3d   :  { %19 = vst.msk [vmem:[#allocation2 - $0xf] ss:$8 sm:$0xc] %vm16_vm3, %v15_v15   ;;  %vm296_vm3 = vcmask 556544  }
  0x42   :  { %454 = vrot.lane.b32.xlu2 %v453_v47, %s826_s17 }
  0x44   :  { %474 = vrot.lane.b32.xlu0 %v473_v35, %s824_s28  ;;  %494 = vrot.lane.b32.xlu1 %v493_v38, %s825_s6 }
  0x4a   :  { %514 = vrot.lane.b32.xlu2 %v513_v0, %s829_s3 }
  0x4c   :  { %534 = vrot.lane.b32.xlu0 %v533_v56, %s827_s22  ;;  %554 = vrot.lane.b32.xlu1 %v553_v57, %s828_s27 }
  0x52   :  { %574 = vrot.lane.b32.xlu2 %v573_v14, %s831_s14 }
  0x54   :  { %594 = vrot.lane.b32.xlu0 %v593_v5, %s830_s0 }
  0x64   :  { %v75_v16 = vpop.permute.xlu2 %74  }
  0x65   :  { %79 = vst.msk [vmem:[#allocation2 + $0x6] sm:$0xc] %vm76_vm4, %v75_v16  }
  0x6c   :  { %v95_v17 = vpop.permute.xlu2 %94  }
  0x6d   :  { %99 = vst.msk [vmem:[#allocation2 + $0x6] sm:$0xc] %vm96_vm5, %v95_v17  }
  0x74   :  { %v155_v20 = vpop.permute.xlu2 %154  }
  0x76   :  { %v27_v18 = vpop.permute.xlu0 %26   ;;  %v47_v19 = vpop.permute.xlu1 %46  }
  0x77   :  { %29 = vst.msk [vmem:[#allocation2] sm:$0x3] %vm28_vm6, %v27_v18   ;;  %vm356_vm6 = vcmask 458144  }
  0x7c   :  { %v215_v23 = vpop.permute.xlu2 %214  }
  0x7e   :  { %v37_v21 = vpop.permute.xlu0 %36   ;;  %v57_v22 = vpop.permute.xlu1 %56  }
  0x7f   :  { %39 = vst.msk [vmem:[#allocation2] sm:$0x3] %vm38_vm7, %v37_v21   ;;  %vm376_vm7 = vcmask 425344  }
  0x80   :  { %49 = vst.msk [vmem:[#allocation2] sm:$0x3] %vm48_vm8, %v47_v19   ;;  %vm396_vm8 = vcmask 392544  }
  0x81   :  { %59 = vst.msk [vmem:[#allocation2] sm:$0x3] %vm58_vm9, %v57_v22   ;;  %vm416_vm9 = vcmask 359744  }
  0x82   :  { %77 = vst.msk [vmem:[#allocation2] sm:$0x3] %vm76_vm4, %v75_v16   ;;  %vm316_vm4 = vcmask 523744  }
  0x83   :  { %97 = vst.msk [vmem:[#allocation2] sm:$0x3] %vm96_vm5, %v95_v17   ;;  %vm336_vm5 = vcmask 490944  }
  0x84   :  { %v275_v26 = vpop.permute.xlu2 %274  }
  0x86   :  { %v115_v24 = vpop.permute.xlu0 %114   ;;  %v135_v25 = vpop.permute.xlu1 %134  }
  0x87   :  { %117 = vst.msk [vmem:[#allocation2] sm:$0x3] %vm116_vm10, %v115_v24  }
  0x88   :  { %119 = vst.msk [vmem:[#allocation2 + $0x6] sm:$0xc] %vm116_vm10, %v115_v24   ;;  %vm436_vm10 = vcmask 326944  }
  0x89   :  { %137 = vst.msk [vmem:[#allocation2] sm:$0x3] %vm136_vm11, %v135_v25  }
  0x8a   :  { %139 = vst.msk [vmem:[#allocation2 + $0x6] sm:$0xc] %vm136_vm11, %v135_v25   ;;  %vm456_vm11 = vcmask 294144  }
  0x8b   :  { %157 = vst.msk [vmem:[#allocation2] sm:$0x3] %vm156_vm12, %v155_v20  }
  0x8c   :  { %159 = vst.msk [vmem:[#allocation2 + $0x6] sm:$0xc] %vm156_vm12, %v155_v20   ;;  %v335_v29 = vpop.permute.xlu2 %334   ;;  %vm476_vm12 = vcmask 261344  }
  0x8e   :  { %v175_v27 = vpop.permute.xlu0 %174   ;;  %v195_v28 = vpop.permute.xlu1 %194  }
  0x8f   :  { %177 = vst.msk [vmem:[#allocation2] sm:$0x3] %vm176_vm13, %v175_v27  }
  0x90   :  { %179 = vst.msk [vmem:[#allocation2 + $0x6] sm:$0xc] %vm176_vm13, %v175_v27   ;;  %vm496_vm13 = vcmask 228544  }
  0x91   :  { %197 = vst.msk [vmem:[#allocation2] sm:$0x3] %vm196_vm14, %v195_v28  }
  0x92   :  { %199 = vst.msk [vmem:[#allocation2 + $0x6] sm:$0xc] %vm196_vm14, %v195_v28   ;;  %vm516_vm14 = vcmask 195744  }
  0x93   :  { %217 = vst.msk [vmem:[#allocation2] sm:$0x3] %vm216_vm15, %v215_v23  }
  0x94   :  { %219 = vst.msk [vmem:[#allocation2 + $0x6] sm:$0xc] %vm216_vm15, %v215_v23   ;;  %v395_v32 = vpop.permute.xlu2 %394   ;;  %vm536_vm15 = vcmask 162944  }
  0x96   :  { %v235_v30 = vpop.permute.xlu0 %234   ;;  %v255_v31 = vpop.permute.xlu1 %254  }
  0x97   :  { %237 = vst.msk [vmem:[#allocation2] sm:$0x3] %vm236_vm0, %v235_v30  }
  0x98   :  { %239 = vst.msk [vmem:[#allocation2 + $0x6] sm:$0xc] %vm236_vm0, %v235_v30   ;;  %vm556_vm0 = vcmask 130144  }
  0x99   :  { %257 = vst.msk [vmem:[#allocation2] sm:$0x3] %vm256_vm1, %v255_v31  }
  0x9a   :  { %259 = vst.msk [vmem:[#allocation2 + $0x6] sm:$0xc] %vm256_vm1, %v255_v31   ;;  %vm576_vm1 = vcmask 97344  }
  0x9b   :  { %277 = vst.msk [vmem:[#allocation2] sm:$0x3] %vm276_vm2, %v275_v26  }
  0x9c   :  { %279 = vst.msk [vmem:[#allocation2 + $0x6] sm:$0xc] %vm276_vm2, %v275_v26   ;;  %v455_v35 = vpop.permute.xlu2 %454   ;;  %vm596_vm2 = vcmask 64544  }
  0x9e   :  { %v295_v33 = vpop.permute.xlu0 %294   ;;  %v315_v34 = vpop.permute.xlu1 %314  }
  0x9f   :  { %297 = vst.msk [vmem:[#allocation2] sm:$0x3] %vm296_vm3, %v295_v33  }
  0xa0   :  { %299 = vst.msk [vmem:[#allocation2 + $0x6] sm:$0xc] %vm296_vm3, %v295_v33  }
  0xa1   :  { %317 = vst.msk [vmem:[#allocation2] sm:$0x3] %vm316_vm4, %v315_v34  }
  0xa2   :  { %319 = vst.msk [vmem:[#allocation2 + $0x6] sm:$0xc] %vm316_vm4, %v315_v34  }
  0xa3   :  { %337 = vst.msk [vmem:[#allocation2] sm:$0x3] %vm336_vm5, %v335_v29  }
  0xa4   :  { %339 = vst.msk [vmem:[#allocation2 + $0x6] sm:$0xc] %vm336_vm5, %v335_v29   ;;  %v515_v38 = vpop.permute.xlu2 %514  }
  0xa6   :  { %v355_v36 = vpop.permute.xlu0 %354   ;;  %v375_v37 = vpop.permute.xlu1 %374  }
  0xa7   :  { %357 = vst.msk [vmem:[#allocation2] sm:$0x3] %vm356_vm6, %v355_v36  }
  0xa8   :  { %359 = vst.msk [vmem:[#allocation2 + $0x6] sm:$0xc] %vm356_vm6, %v355_v36  }
  0xa9   :  { %377 = vst.msk [vmem:[#allocation2] sm:$0x3] %vm376_vm7, %v375_v37  }
  0xaa   :  { %379 = vst.msk [vmem:[#allocation2 + $0x6] sm:$0xc] %vm376_vm7, %v375_v37  }
  0xab   :  { %397 = vst.msk [vmem:[#allocation2] sm:$0x3] %vm396_vm8, %v395_v32  }
  0xac   :  { %399 = vst.msk [vmem:[#allocation2 + $0x6] sm:$0xc] %vm396_vm8, %v395_v32   ;;  %v575_v41 = vpop.permute.xlu2 %574  }
  0xae   :  { %v415_v39 = vpop.permute.xlu0 %414   ;;  %v435_v40 = vpop.permute.xlu1 %434  }
  0xaf   :  { %417 = vst.msk [vmem:[#allocation2] sm:$0x3] %vm416_vm9, %v415_v39  }
  0xb0   :  { %419 = vst.msk [vmem:[#allocation2 + $0x6] sm:$0xc] %vm416_vm9, %v415_v39  }
  0xb1   :  { %437 = vst.msk [vmem:[#allocation2] sm:$0x3] %vm436_vm10, %v435_v40  }
  0xb2   :  { %439 = vst.msk [vmem:[#allocation2 + $0x6] sm:$0xc] %vm436_vm10, %v435_v40  }
  0xb3   :  { %457 = vst.msk [vmem:[#allocation2] sm:$0x3] %vm456_vm11, %v455_v35  }
  0xb4   :  { %459 = vst.msk [vmem:[#allocation2 + $0x6] sm:$0xc] %vm456_vm11, %v455_v35  }
  0xb6   :  { %v475_v42 = vpop.permute.xlu0 %474   ;;  %v495_v43 = vpop.permute.xlu1 %494  }
  0xb7   :  { %477 = vst.msk [vmem:[#allocation2] sm:$0x3] %vm476_vm12, %v475_v42  }
  0xb8   :  { %479 = vst.msk [vmem:[#allocation2 + $0x6] sm:$0xc] %vm476_vm12, %v475_v42  }
  0xb9   :  { %497 = vst.msk [vmem:[#allocation2] sm:$0x3] %vm496_vm13, %v495_v43  }
  0xba   :  { %499 = vst.msk [vmem:[#allocation2 + $0x6] sm:$0xc] %vm496_vm13, %v495_v43  }
  0xbb   :  { %517 = vst.msk [vmem:[#allocation2] sm:$0x3] %vm516_vm14, %v515_v38  }
  0xbc   :  { %519 = vst.msk [vmem:[#allocation2 + $0x6] sm:$0xc] %vm516_vm14, %v515_v38  }
  0xbe   :  { %v535_v44 = vpop.permute.xlu0 %534   ;;  %v555_v45 = vpop.permute.xlu1 %554  }
  0xbf   :  { %537 = vst.msk [vmem:[#allocation2] sm:$0x3] %vm536_vm15, %v535_v44  }
  0xc0   :  { %539 = vst.msk [vmem:[#allocation2 + $0x6] sm:$0xc] %vm536_vm15, %v535_v44  }
  0xc1   :  { %557 = vst.msk [vmem:[#allocation2] sm:$0x3] %vm556_vm0, %v555_v45  }
  0xc2   :  { %559 = vst.msk [vmem:[#allocation2 + $0x6] sm:$0xc] %vm556_vm0, %v555_v45  }
  0xc3   :  { %577 = vst.msk [vmem:[#allocation2] sm:$0x3] %vm576_vm1, %v575_v41  }
  0xc4   :  { %579 = vst.msk [vmem:[#allocation2 + $0x6] sm:$0xc] %vm576_vm1, %v575_v41  }
  0xc6   :  { %v595_v46 = vpop.permute.xlu0 %594  }
  0xc7   :  { %597 = vst.msk [vmem:[#allocation2] sm:$0x3] %vm596_vm2, %v595_v46  }
  0xc8   :  { %599 = vst.msk [vmem:[#allocation2 + $0x6] sm:$0xc] %vm596_vm2, %v595_v46  }
  0xce   :  { %v602_v47 = vld [vmem:[#allocation2] sm:$0x3] }
  0xcf   :  { %605 = vst [vmem:[#allocation0] sm:$0x3] %v602_v47  ;;  %v607_v48 = vld [vmem:[#allocation2 + $0x8] sm:$0x3] }
  0xd0   :  { %611 = vst [vmem:[#allocation0 + $0x2] sm:$0x3] %v607_v48 }
  0xd1   :  { %620 = dma.vmem_to_hbm [thread:$0]  %s616_s16, 64, %s618_s1, [#allocation1]  }
  0xd2   :  { %799 = dma.done.wait [#allocation1], 64  }
  0xd3   :  { %800 = vsyncadd [#allocation1], 4294967232 }
  0xd4   :  { %623 = vsyncpa [#allocation1], 1 }

// kernel: _lambda_.1
= control target key start
LH: loop header
LB: loop body
LE: loop exit
PB: predicated region body
PF: predicated region fallthrough
CT: control target
= control target key end

     0   :  { %s3920_s0 = inlined_call_operand.vmem [shape: bf16[2,34,32], index: 0, kind: input, shape index: {}]   ;;  %s3921_s1 = inlined_call_operand.vmem [shape: bf16[2,32,32], index: 1, kind: input, shape index: {}]   ;;  %s3922_s2 = inlined_call_operand.vmem [shape: f32[2,1,32], index: 2, kind: input, shape index: {}]   ;;  %s3923_s3 = inlined_call_operand.hbm [shape: bf16[2,256,64], index: 3, kind: input, shape index: {}]   ;;  %s3924_s4 = inlined_call_operand.vmem [shape: f32[2,1,64], index: 4, kind: input, shape index: {}]   ;;  %s3925_s5 = inlined_call_operand.hbm [shape: bf16[2,512,60], index: 5, kind: input, shape index: {}]   ;;  %s3926_s6 = inlined_call_operand.vmem [shape: f32[2,1,60], index: 6, kind: input, shape index: {}]   ;;  %s3927_s7 = inlined_call_operand.vmem [shape: bf16[2,4,60,256], index: 7, kind: input, shape index: {}]   ;;  %s3928_s8 = inlined_call_operand.vmem [shape: f32[2,1,256], index: 8, kind: input, shape index: {}]   ;;  %s3929_s9 = inlined_call_operand.hbm [shape: bf16[2,256,128], index: 9, kind: input, shape index: {}]   ;;  %s3930_s10 = inlined_call_operand.vmem [shape: f32[2,1,128], index: 10, kind: input, shape index: {}]   ;;  %s3931_s11 = inlined_call_operand.vmem [shape: f32[2,2,4,60], index: 11, kind: output, shape index: {0}]   ;;  %s3932_s12 = inlined_call_operand.vmem [shape: f32[2,2,128], index: 12, kind: output, shape index: {1}]  }
   0x1   :  { %3941 = sst [smem:[#allocation17_spill]] %s3925_s5 }
   0x2   :  { %3942 = sst [smem:[#allocation18_spill]] %s3928_s8 }
   0x3   :  { %3943 = sst [smem:[#allocation19_spill]] %s3930_s10 }
   0x4   :  { %3944 = sst [smem:[#allocation20_spill]] %s3931_s11 }
   0x5   :  { %3945 = sst [smem:[#allocation21_spill]] %s3932_s12 }
   0x6   :  { %18 = vsyncpa [#allocation8], 0 }
   0x7   :  { %20 = vsyncpa [#allocation8 + $0x1], 0 }
   0x8   :  { %21 = vsyncpa [#allocation10], 0 }
   0x9   :  { %23 = vsyncpa [#allocation10 + $0x1], 0  ;;  %s3328_s21 = smov 0   ;;  %s3330_s22 = smov 0  }
   0xa   :  { %s3332_s23 = smov 0   ;;  %s3334_s24 = smov 0  }
   0xb LB: > { %3946 = sst [smem:[#allocation14_spill]] %s3250_s23  ;;  %s3347_s25 = sadd.s32 4294967295, %s3254_s24   ;;  %s3254_s24 = sphi %s3334_s24, %s3959_s24   ;;  %s3250_s23 = sphi %s3332_s23, %s3961_s23   ;;  %s3246_s22 = sphi %s3330_s22, %s3963_s22   ;;  %s3242_s21 = sphi %s3328_s21, %s3962_s21  }
   0xc   : > { %s3350_s26 = sadd.s32 1, %s3254_s24   ;;  %s114_s28 = sadd.s32 1, %s3250_s23 }
   0xd   : > { %3947 = sst [smem:[#allocation15_spill]] %s3350_s26  ;;  %s111_s27 = ssub.s32 %s3254_s24, %s3350_s26 }
   0xe   : > { %p112_p0 = scmp.eq.s32.totalorder %s111_s27, 0  ;;  %p121_p1 = scmp.ne.s32.totalorder %s3250_s23, %s3246_s22 }
   0xf   : > { %p122_p2 = scmp.eq.s32.totalorder %s3254_s24, 0  ;;  %p127_p3 = scmp.ne.s32.totalorder %s3246_s22, %s3242_s21 }
  0x10   : > { %s3360_s29 = scalar_select %p112_p0, %s3250_s23, %s114_s28  }
  0x11   : > { %p123_p4 = por %p122_p2, %p121_p1  ;;  %p128_p5 = scmp.eq.s32.totalorder %s3347_s25, 0 }
  0x12   : > { %3948 = sst [smem:[#allocation16_spill]] %s3360_s29  ;;  %p3082_p6 = scmp.lt.s32.totalorder %s3254_s24, 2 }
  0x13   : > { %p3364_p7 = por %p128_p5, %p127_p3  ;;  %s3369_s13 = sand.u32 1, %s3250_s23  }
  0x14   : > { %p3371_p8 = pnand %p3082_p6, %p123_p4  ;;  %s435_s15 = sand.u32 1, %s3254_s24  }
  0x15   : > { %s2484_s16 = sshll.u32 %s3369_s13, 8  ;;  %s2944_s17 = sshll.u32 %s3254_s24, 8 }
  0x16   : > { %s3951_s5 = sld [smem:[#allocation17_spill]]  ;;  %s439_s27 = scalar_lea.vmem [#allocation9], %s2484_s16 }
  0x17   : > { %s447_s28 = sshll.u32 %s439_s27, 4  ;;  %s3381_s29 = scalar_lea.sflag [#allocation10], %s435_s15  ;;  %s448_s28 = int_to_ptr.vmem [resolvable:$true] %s447_s28 }
  0x18   : > { %p3130_p10 = pneg %p3371_p8 }
  0x1c   : > { %s444_s20 = scalar_lea.hbm %s3951_s5, %s2944_s17  ;;  %s3133_s17 = scalar_lea.hbm %s3951_s5, 512 }
  0x1d   : > { %s445_s21 = sshll.u32 %s444_s20, 4  ;;  %s446_s21 = int_to_ptr.hbm [resolvable:$true] %s445_s21 }
  0x1e   : > { %s3126_s23 = sshra.s32 %s446_s21, 4  ;;  %s3127_s23 = int_to_ptr.hbm [resolvable:$true] %s3126_s23 }
  0x1f   : > { %s3128_s26 = scalar_lea.hbm %s3127_s23, 256  ;;  %p3134_p13 = scmp.lt.s32.totalorder %s3127_s23, %s3951_s5 }
  0x20   : > { %p3129_p9 = scmp.ne.s32.totalorder %s3127_s23, %s3128_s26  ;;  %p3135_p0 = scmp.lt.s32.totalorder %s3133_s17, %s3128_s26 }
  0x22   : > { %p3131_p11 = pnand %p3130_p10, %p3129_p9  ;;  %p3136_p1 = por %p3135_p0, %p3134_p13 }
  0x24   : > { %p3132_p12 = pneg %p3131_p11 }
  0x26   : > { %p3137_p2 = pnand %p3136_p1, %p3132_p12 }
  0x28   : > { %3140 = shalt.err (!%p3137_p2)
}
  0x29   : > { %s3936_s15 = smov 64   ;;  %s3938_s20 = smov 4  }
  0x2a   : > { %3078 = dma.hbm_to_vmem [thread:$0]  (!%p3371_p8), %s446_s21, 4096, %s448_s28, %s3381_s29, %s3936_s15, %s3936_s15, %s3938_s20  }
  0x2b   : > { %p2490_p3 = scmp.ge.s32.totalorder %s3254_s24, 1  ;;  %p504_p4 = scmp.lt.s32.totalorder %s3254_s24, 3 }
  0x2c   : > { %s2481_s12 = sshll.u32 %s3369_s13, 7  ;;  %s2943_s26 = sshll.u32 %s3254_s24, 7 }
  0x2d   : > { %p3403_p5 = pnand %p2490_p3, %p504_p4  ;;  %s411_s27 = scalar_lea.vmem [#allocation7], %s2481_s12 }
  0x2e   : > { %s419_s18 = sshll.u32 %s411_s27, 4  ;;  %s416_s19 = scalar_lea.hbm %s3923_s3, %s2943_s26  ;;  %s420_s18 = int_to_ptr.vmem [resolvable:$true] %s419_s18 }
  0x2f   : > { %s417_s5 = sshll.u32 %s416_s19, 4  ;;  %s487_s28 = scalar_lea.hbm %s3929_s9, %s2943_s26  ;;  %s418_s5 = int_to_ptr.hbm [resolvable:$true] %s417_s5 }
  0x30   : > { %s408_s15 = scalar_lea.sflag [#allocation8], %s3369_s13  ;;  %s3156_s20 = sshra.s32 %s418_s5, 4  ;;  %s3157_s20 = int_to_ptr.hbm [resolvable:$true] %s3156_s20 }
  0x31   : > { %s3158_s10 = scalar_lea.hbm %s3157_s20, 128  ;;  %s3163_s17 = scalar_lea.hbm %s3923_s3, 256 }
  0x32   : > { %p3159_p6 = scmp.ne.s32.totalorder %s3157_s20, %s3158_s10  ;;  %p3164_p12 = scmp.lt.s32.totalorder %s3157_s20, %s3923_s3 }
  0x33   : > { %p3165_p13 = scmp.lt.s32.totalorder %s3163_s17, %s3158_s10 }
  0x34   : > { %p3161_p9 = pnand %p3159_p6, %p3130_p10 }
  0x35   : > { %p3166_p0 = por %p3165_p13, %p3164_p12 }
  0x36   : > { %p3162_p11 = pneg %p3161_p9 }
  0x38   : > { %p3167_p1 = pnand %p3166_p0, %p3162_p11 }
  0x3a   : > { %3170 = shalt.err (!%p3167_p1)
}
  0x3b   : > { %s3953_s8 = smov 4   ;;  %s3954_s13 = smov 64  }
  0x3c   : > { %3075 = dma.hbm_to_vmem [thread:$0]  (!%p3371_p8), %s418_s5, 2048, %s420_s18, %s408_s15, %s3954_s13, %s3954_s13, %s3953_s8  }
  0x3d   : > { %s488_s26 = sshll.u32 %s487_s28, 4  ;;  %s482_s21 = scalar_lea.vmem [#allocation11], %s2481_s12  ;;  %s489_s26 = int_to_ptr.hbm [resolvable:$true] %s488_s26 }
  0x3e   : > { %s490_s11 = sshll.u32 %s482_s21, 4  ;;  %s3186_s24 = sshra.s32 %s489_s26, 4  ;;  %s491_s11 = int_to_ptr.vmem [resolvable:$true] %s490_s11  ;;  %s3187_s24 = int_to_ptr.hbm [resolvable:$true] %s3186_s24 }
  0x3f   : > { %s3188_s27 = scalar_lea.hbm %s3187_s24, 128  ;;  %s3193_s17 = scalar_lea.hbm %s3929_s9, 256 }
  0x40   : > { %p3189_p2 = scmp.ne.s32.totalorder %s3187_s24, %s3188_s27  ;;  %p3194_p6 = scmp.lt.s32.totalorder %s3187_s24, %s3929_s9 }
  0x41   : > { %p3195_p9 = scmp.lt.s32.totalorder %s3193_s17, %s3188_s27 }
  0x42   : > { %p3191_p3 = pnand %p3189_p2, %p3130_p10 }
  0x43   : > { %p3196_p11 = por %p3195_p9, %p3194_p6 }
  0x44   : > { %p3192_p4 = pneg %p3191_p3 }
  0x46   : > { %p3197_p12 = pnand %p3196_p11, %p3192_p4 }
  0x48   : > { %3200 = shalt.err (!%p3197_p12)
}
  0x49   : > { %3081 = dma.hbm_to_vmem [thread:$0]  (!%p3371_p8), %s489_s26, 2048, %s491_s11, %s3381_s29, %s3954_s13, %s3954_s13, %s3953_s8  }
  0x4a   : > { %508 = sbr.rel (%p3403_p5) target bundleno = 1240 (0x4d8), region = 64  ;;  %s3447_s5 = sand.u32 (!%p3403_p5), 1, %s3246_s22  }
  0x4b   : > { %s2491_s15 = sshll.u32 (!%p3403_p5), %s3447_s5, 7  ;;  %s511_s12 = scalar_lea.sflag (!%p3403_p5), [#allocation8], %s3447_s5 }
  0x4c   : > { %s3453_s18 = scalar_lea.vmem (!%p3403_p5), [#allocation7], %s2491_s15 }
  0x4f   : > { %3233 = dma.done.wait (%p3364_p7), %s511_s12, 2048  }
  0x50   : > { %3235 = vsyncadd (%p3364_p7), %s511_s12, 4294965248  ;;  %s520_s11 = sand.u32 1, %s3347_s25   ;;  %s2492_s29 = sshll.u32 %s3447_s5, 8 }
  0x51   : > { %s521_s14 = scalar_lea.sflag [#allocation10], %s520_s11  ;;  %s3461_s23 = scalar_lea.vmem [#allocation9], %s2492_s29 }
  0x52   : > { %3237 = dma.done.wait (%p3364_p7), %s521_s14, 6144  }
  0x53   : > { %3239 = vsyncadd (%p3364_p7), %s521_s14, 4294961152  ;;  %p621_p8 = scmp.lt.s32.totalorder %s3347_s25, 1  ;;  %vm662_vm0 = vcmask 261120   ;;  %v3258_v3 = vmov 0.0   ;;  %vm665_vm1 = vcmask 254976   ;;  %vm673_vm2 = vcmask 257024  }
  0x54   : > { %663 = vst.msk [vmem:[#allocation2] sm:$0xff] %vm662_vm0, %v3258_v3  ;;  %v3259_v8 = vmov 0   ;;  %vm678_vm3 = vcmask 253952   ;;  %vm793_vm4 = vcmask 261121   ;;  %vm785_vm5 = vcmask 257026   ;;  %s3260_s16 = smov 64  }
  0x55   : > { %s3965_s25 = smov (!%p621_p8, %s3347_s25), 1  ;;  %664 = vst.msk [vmem:[#allocation2 + $0x8] sm:$0xff] %vm662_vm0, %v3258_v3  ;;  %vm776_vm6 = vcmask 1041408   ;;  %vm777_vm7 = vcmask 1045508   ;;  %vm787_vm8 = vcmask 256000   ;;  %s3261_s19 = smov 96  }
  0x56   : > { %s2946_s28 = sshll.u32 %s3965_s25, 4  ;;  %s3065_s21 = smul.u32 20, %s3965_s25  ;;  %666 = vst.msk [vmem:[#allocation2 + $0x10] sm:$0x3] %vm665_vm1, %v3258_v3  ;;  %vm788_vm9 = vsmask.f32 2304  ;;  %vm778_vm10 = vmor %vm776_vm6, %vm777_vm7 }
  0x57   : > { %s630_s26 = scalar_lea.vmem %s3921_s1, %s2946_s28  ;;  %s633_s10 = scalar_lea.vmem %s3922_s2, %s3965_s25  ;;  %674 = vst.msk [vmem:[#allocation5] sm:$0xf] %vm673_vm2, %v3259_v8  ;;  %vm789_vm11 = vmand %vm787_vm8, %vm788_vm9  ;;  %vm824_vm12 = vsmask.f32 7946  ;;  %vm805_vm14 = vsmask.f32 6416 }
  0x58   : > { %v2952_v0 = vld [vmem:[%s630_s26 + $0x8] sm:$0xff]  ;;  %v2951_v1 = vld [vmem:[%s630_s26] sm:$0xff]  ;;  %s625_s17 = scalar_lea.vmem %s3920_s0, %s3065_s21  ;;  %675 = vst.msk [vmem:[#allocation5 + $0x4] sm:$0xf] %vm673_vm2, %v3259_v8  ;;  %vm825_vm13 = vmand %vm785_vm5, %vm824_vm12  ;;  %s3262_s12 = smov 32   ;;  %vm945_vm7 = vcmask 1044480  }
  0x59   : > { %738 = vmatpush.bf16.msra.mxu0 %v2952_v0  ;;  %v2949_v2 = vld [vmem:[%s625_s17] sm:$0xff]  ;;  %v2950_v4 = vld [vmem:[%s625_s17 + $0x8] sm:$0xff]  ;;  %v689_v5 = vld [vmem:[%s625_s17 + $0x10] sm:$0x1]  ;;  %679 = vst.msk [vmem:[#allocation5 + $0x10] sm:$0x1] %vm678_vm3, %v3259_v8  ;;  %s636_s14 = scalar_lea.vmem %s3924_s4, %s3965_s25  ;;  %s639_s26 = scalar_lea.vmem %s3926_s6, %s3965_s25 }
  0x5a   : > { %v707_v6 = vunpack.c.l.b16 %v689_v5  ;;  %676 = vst.msk [vmem:[#allocation5 + $0x8] sm:$0xf] %vm673_vm2, %v3259_v8  ;;  %v3122_v9 = vld [vmem:[%s633_s10] ss:$0 sm:$0xff]  ;;  %vm806_vm15 = vmor %vm788_vm9, %vm805_vm14  ;;  %vm851_vm6 = vsmask.f32 7424 }
  0x5b   : > { %677 = vst.msk [vmem:[#allocation5 + $0xc] sm:$0xf] %vm673_vm2, %v3259_v8  ;;  %vm955_vm2 = vsmask.f32 4352  ;;  %vm989_vm9 = vcmask 785408   ;;  %vm1198_vm12 = vcmask 519170  }
  0x5c   : > { %v710_v7 = vpack.c.b16 %v707_v6, %v707_v6  ;;  %vm1204_vm14 = vcmask 518144   ;;  %s2948_s20 = sshll.u32 %s3965_s25, 3  ;;  %s3857_s11 = scalar_lea.vmem [#allocation11], %s2491_s15 }
  0x5d   : > { %739 = vmatpush.bf16.msra.mxu0 %v2951_v1  ;;  %s3956_s29 = sld [smem:[#allocation19_spill]] }
  0x5e   : > { %s3957_s13 = sld [smem:[#allocation18_spill]] }
  0x5f   : > { %v790_v34 = vld [vmem:[#allocation5 + $0x4] sm:$0x7]  ;;  %s3958_s10 = sld [smem:[#allocation21_spill]] }
  0x60   : > { %2519 = vmatmul.msk.bf16.vlgmr.msra.gmra.mxu0 %vm662_vm0, %v2949_v2  ;;  %v840_v1 = vld [vmem:[#allocation5 + $0x10] sm:$0x1] }
  0x61   : > { %v826_v48 = vld [vmem:[#allocation5 + $0x8] sm:$0xc] }
  0x70   : > { %2520 = vmatmul.msk.bf16.gmra.mxu0 %vm662_vm0, %v2950_v4 }
  0x80   : > { %2521 = vmatmul.msk.bf16.gmra.mxu0 %vm662_vm0, %v710_v7  ;;  %v942_v7 = vunpack.c.l.b16 %v840_v1 }
  0xdd   : > { %v741_v10 = vpop.f32.mrf.mxu0 }
  0xde   : > { %v742_v11 = vadd.f32 %v3122_v9, %v741_v10 }
  0xe0   : > { %v755_v12 = vmax.f32 %v742_v11, 0.0 }
  0xe2   : > { %760 = vst.msk [vmem:[#allocation2 + $0x1] sm:$0xff] %vm662_vm0, %v755_v12 }
  0xe5   : > { %v743_v13 = vpop.f32.mrf.mxu0 }
  0xe6   : > { %v744_v14 = vadd.f32 %v3122_v9, %v743_v13 }
  0xe8   : > { %v756_v15 = vmax.f32 %v744_v14, 0.0 }
  0xea   : > { %761 = vst.msk [vmem:[#allocation2 + $0x9] sm:$0xff] %vm662_vm0, %v756_v15 }
  0xed   : > { %v746_v16 = vpop.f32.mrf.mxu0 }
  0xee   : > { %v747_v17 = vadd.f32 %v3122_v9, %v746_v16  ;;  %v3518_v16 = vpack.c.b16 %v942_v7, %v942_v7 }
  0xf0   : > { %v757_v18 = vmax.f32 %v747_v17, 0.0 }
  0xf1   : > { %v763_v19 = vld [vmem:[#allocation2] ss:$2 sm:$0xff]  ;;  %v767_v20 = vld [vmem:[#allocation2 + $0x1] ss:$2 sm:$0xff] }
  0xf2   : > { %762 = vst.msk [vmem:[#allocation2 + $0x11] sm:$0x1] %vm678_vm3, %v757_v18  ;;  %v770_v21 = vmax.f32 %v763_v19, %v767_v20  ;;  %v765_v26 = vld [vmem:[#allocation2 + $0x10] ss:$2 sm:$0x1]  ;;  %vm913_vm3 = vcmask 1045504  }
  0xf3   : > { %794 = vst.msk [vmem:[#allocation2] sm:$0xfe] %vm793_vm4, %v757_v18  ;;  %vm917_vm4 = vsmask.f32 5376 }
  0xf4   : > { %v772_v22 = vpack.c.bf16 %v770_v21, %v770_v21 }
  0xf5   : > { %v748_v23 = vpop.f32.mrf.mxu0 }
  0xf6   : > { %v749_v24 = vadd.f32 %v3122_v9, %v748_v23  ;;  %v779_v25 = vrot.slane %v772_v22, 6 }
  0xf8   : > { %v758_v27 = vmax.f32 %v749_v24, 0.0  ;;  %786 = vst.msk [vmem:[#allocation5] sm:$0xc] %vm785_vm5, %v779_v25  ;;  %v780_v32 = vrot.slane %v779_v25, 4  ;;  %vm885_vm5 = vsmask.f32 6400 }
  0xf9   : > { %v769_v28 = vld [vmem:[#allocation2 + $0x11] ss:$2 sm:$0x1] }
  0xfa   : > { %v771_v29 = vmax.f32 %v765_v26, %v769_v28  ;;  %795 = vst.msk [vmem:[#allocation2 + $0x8] sm:$0xff] %vm662_vm0, %v758_v27 }
  0xfc   : > { %v773_v30 = vpack.c.bf16 %v771_v29, %v771_v29 }
  0xfd   : > { %v751_v31 = vpop.f32.mrf.mxu0 }
  0xfe   : > { %v781_v33 = vrot.slane %v773_v30, 6  ;;  %v752_v35 = vadd.f32 %v3122_v9, %v751_v31 }
  0xff   : > { %v839_v59 = vld [vmem:[#allocation5] sm:$0x8] }
 0x100   : > { %v782_v36 = vsel %vm778_vm10, %v780_v32, %v781_v33  ;;  %v759_v37 = vmax.f32 %v752_v35, 0.0  ;;  %v835_v61 = vld [vmem:[#allocation5] sm:$0xe]  ;;  %v941_v63 = vunpack.c.l.b16 %v839_v59  ;;  %vm669_vm10 = vcmask 519168  }
 0x101   : > { %v791_v38 = vsel %vm789_vm11, %v782_v36, %v790_v34  ;;  %v797_v39 = vld [vmem:[#allocation2] ss:$2 sm:$0xff]  ;;  %v799_v40 = vld [vmem:[#allocation2 + $0x1] ss:$2 sm:$0xff]  ;;  %v837_v0 = vld [vmem:[#allocation5] sm:$0xc]  ;;  %v873_v2 = vunpack.c.l.b16 %v835_v61 }
 0x102   : > { %792 = vst [vmem:[#allocation5 + $0x4] sm:$0x7] %v791_v38  ;;  %v801_v41 = vmax.f32 %v797_v39, %v799_v40  ;;  %v909_v6 = vunpack.c.l.b16 %v837_v0  ;;  %vm683_vm11 = vcmask 517120  }
 0x103   : > { %796 = vst.msk [vmem:[#allocation2 + $0x10] sm:$0x3] %vm665_vm1, %v759_v37  ;;  %vm877_vm1 = vcmask 1046528  }
 0x104   : > { %v803_v42 = vpack.c.bf16 %v801_v41, %v801_v41  ;;  %670 = vst.msk [vmem:[#allocation3 + $0x8] sm:$0xf] %vm669_vm10, %v3258_v3 }
 0x105   : > { %v753_v43 = vpop.f32.mrf.mxu0  ;;  %680 = vst.msk [vmem:[#allocation6] sm:$0xf] %vm669_vm10, %v3259_v8 }
 0x106   : > { %v808_v44 = vshrl.u32 %v803_v42, 16  ;;  %v811_v45 = vshll.u32 %v803_v42, 16  ;;  %681 = vst.msk [vmem:[#allocation6 + $0x4] sm:$0xf] %vm669_vm10, %v3259_v8 }
 0x107   : > { %682 = vst.msk [vmem:[#allocation6 + $0x8] sm:$0xf] %vm669_vm10, %v3259_v8 }
 0x108   : > { %v810_v46 = vrot.slane %v808_v44, 5  ;;  %v813_v47 = vrot.slane %v811_v45, 6  ;;  %684 = vst.msk [vmem:[#allocation6 + $0xc] sm:$0x3] %vm683_vm11, %v3259_v8 }
 0x109   : > { %v3507_v56 = vld [vmem:[#allocation5] sm:$0xff]  }
 0x10a   : > { %v798_v49 = vld [vmem:[#allocation2 + $0x10] ss:$2 sm:$0x1]  ;;  %v800_v50 = vld [vmem:[#allocation2 + $0x11] ss:$2 sm:$0x1]  ;;  %v814_v51 = vor.u32 %v813_v47, %v810_v46  ;;  %v3052_v60 = vunpack.c.h.b16 %v3507_v56 }
 0x10b   : > { %v802_v52 = vmax.f32 %v798_v49, %v800_v50  ;;  %v855_v24 = vshll.u32 %v3507_v56, 16 }
 0x10c   : > { %v827_v53 = vsel %vm825_vm13, %v814_v51, %v826_v48  ;;  %v815_v57 = vrot.slane %v814_v51, 4  ;;  %v3512_v4 = vpack.c.b16 %v3052_v60, %v941_v63  ;;  %v875_v5 = vpack.c.b16 %v3052_v60, %v873_v2 }
 0x10d   : > { %v804_v54 = vpack.c.bf16 %v802_v52, %v802_v52  ;;  %828 = vst [vmem:[#allocation5 + $0x8] sm:$0xc] %v827_v53  ;;  %v911_v9 = vpack.c.b16 %v3052_v60, %v909_v6  ;;  %v969_v51 = vshrl.u32 %v3518_v16, 16  ;;  %v972_v52 = vshll.u32 %v3518_v16, 16 }
 0x10e   : > { %v957_v10 = vshrl.u32 %v3512_v4, 16  ;;  %v960_v11 = vshll.u32 %v3512_v4, 16  ;;  %v887_v14 = vshrl.u32 %v875_v5, 16  ;;  %v878_v23 = vrot.slane %v875_v5, 1 }
 0x10f   : > { %v817_v55 = vshll.u32 %v804_v54, 16  ;;  %v919_v19 = vshrl.u32 %v911_v9, 16  ;;  %v922_v20 = vshll.u32 %v911_v9, 16  ;;  %v890_v28 = vshll.u32 %v875_v5, 16 }
 0x110   : > { %v959_v25 = vrot.slane %v957_v10, 3  ;;  %v962_v26 = vrot.slane %v960_v11, 4  ;;  %v889_v27 = vrot.slane %v887_v14, 1  ;;  %v914_v48 = vrot.slane %v911_v9, 2 }
 0x111   : > { %v819_v58 = vrot.slane %v817_v55, 6  ;;  %v921_v33 = vrot.slane %v919_v19, 2  ;;  %v924_v34 = vrot.slane %v922_v20, 3  ;;  %v892_v42 = vrot.slane %v890_v28, 2  ;;  %v2959_v19 = vld [vmem:[%s3453_s18 + $0x30] sm:$0xff]  ;;  %v2966_v20 = vld [vmem:[%s3453_s18 + $0x68] sm:$0xff] }
 0x112   : > { %v963_v45 = vor.u32 %v962_v26, %v959_v25  ;;  %v857_v60 = vrot.slane %v855_v24, 1  ;;  %v971_v61 = vrot.slane %v969_v51, 3  ;;  %v853_v63 = vshrl.u32 %v3507_v56, 16  ;;  %v2964_v24 = vld [vmem:[%s3453_s18 + $0x58] sm:$0xff]  ;;  %v2963_v26 = vld [vmem:[%s3453_s18 + $0x50] sm:$0xff]  ;;  %v2962_v28 = vld [vmem:[%s3453_s18 + $0x48] sm:$0xff] }
 0x113   : > { %v820_v62 = vsel %vm806_vm15, %v815_v57, %v819_v58  ;;  %v925_v49 = vor.u32 %v924_v34, %v921_v33  ;;  %v893_v59 = vor.u32 %v892_v42, %v889_v27  ;;  %v974_v1 = vrot.slane %v972_v52, 4  ;;  %v2956_v25 = vld [vmem:[%s3453_s18 + $0x18] sm:$0xff]  ;;  %v2955_v27 = vld [vmem:[%s3453_s18 + $0x10] sm:$0xff] }
 0x114   : > { %830 = vst.msk [vmem:[#allocation5 + $0xc] sm:$0x7] %vm787_vm8, %v820_v62  ;;  %v858_v5 = vor.u32 %v857_v60, %v853_v63  ;;  %v946_v6 = vrot.slane %v3512_v4, 3  ;;  %vm667_vm8 = vcmask 523264   ;;  %vm1200_vm13 = vcmask 516096  }
 0x115   : > { %v975_v9 = vor.u32 %v974_v1, %v971_v61  ;;  %668 = vst.msk [vmem:[#allocation3] sm:$0xff] %vm667_vm8, %v3258_v3  ;;  %vm1213_vm15 = vcmask 519169  }
 0x11b   : > { %v3516_v12 = vld [vmem:[#allocation5 + $0x8] sm:$0xff]  }
 0x11c   : > { %v836_v13 = vld [vmem:[#allocation5 + $0xc] sm:$0x7]  ;;  %v847_v17 = vunpack.c.l.b16 %v3516_v12  ;;  %v927_v30 = vshrl.u32 %v3516_v12, 16  ;;  %v930_v31 = vshll.u32 %v3516_v12, 16  ;;  %v915_v47 = vrot.slane %v3516_v12, 2 }
 0x11d   : > { %v834_v15 = vld [vmem:[#allocation5 + $0xc] sm:$0x3]  ;;  %v874_v18 = vunpack.c.l.b16 %v836_v13  ;;  %v947_v2 = vrot.slane %v3516_v12, 3  ;;  %v949_v13 = vrot.slane %v3518_v16, 3  ;;  %v2968_v16 = vld [vmem:[%s3453_s18 + $0x78] sm:$0xff] }
 0x11e   : > { %v848_v21 = vunpack.c.l.b16 %v834_v15  ;;  %v964_v38 = vrot.slane %v927_v30, 3  ;;  %v965_v39 = vrot.slane %v930_v31, 4  ;;  %v929_v40 = vrot.slane %v927_v30, 2  ;;  %1163 = vmatpush.bf16.msra.mxu2 %v2968_v16  ;;  %v2961_v30 = vld [vmem:[%s3453_s18 + $0x40] sm:$0xff] }
 0x11f   : > { %v3521_v22 = vpack.c.b16 %v874_v18, %v847_v17  ;;  %v932_v41 = vrot.slane %v930_v31, 3  ;;  %v3543_v57 = vsel %vm913_vm3, %v914_v48, %v915_v47  ;;  %v948_v10 = vsel %vm945_vm7, %v946_v6, %v947_v2  ;;  %v2967_v18 = vld [vmem:[%s3453_s18 + $0x70] sm:$0xff]  ;;  %v2953_v31 = vld [vmem:[%s3453_s18] sm:$0xff] }
 0x120   : > { %v3529_v36 = vpack.c.b16 %v848_v21, %v847_v17  ;;  %v966_v46 = vor.u32 %v965_v39, %v964_v38  ;;  %v950_v4 = vsel %vm945_vm7, %v947_v2, %v949_v13  ;;  %v2960_v17 = vld [vmem:[%s3453_s18 + $0x38] sm:$0xff]  ;;  %v2958_v21 = vld [vmem:[%s3453_s18 + $0x28] sm:$0xff] }
 0x121   : > { %v879_v29 = vrot.slane %v3521_v22, 1  ;;  %v895_v32 = vshrl.u32 %v3521_v22, 16  ;;  %v898_v35 = vshll.u32 %v3521_v22, 16  ;;  %v933_v50 = vor.u32 %v932_v41, %v929_v40  ;;  %1144 = vmatpush.bf16.msra.mxu1 %v2960_v17  ;;  %v2965_v22 = vld [vmem:[%s3453_s18 + $0x60] sm:$0xff] }
 0x122   : > { %v967_v53 = vsel %vm955_vm2, %v963_v45, %v966_v46  ;;  %v860_v55 = vshll.u32 %v3529_v36, 16  ;;  %v976_v11 = vsel %vm955_vm2, %v966_v46, %v975_v9  ;;  %v864_v14 = vshrl.u32 %v3529_v36, 16  ;;  %1164 = vmatpush.bf16.msra.mxu2 %v2967_v18 }
 0x123   : > { %v880_v37 = vsel %vm877_vm1, %v878_v23, %v879_v29  ;;  %v897_v43 = vrot.slane %v895_v32, 1  ;;  %v900_v44 = vrot.slane %v898_v35, 2  ;;  %977 = vrot.lane.b32.xlu1 %v967_v53, %s3261_s19  ;;  %v934_v58 = vsel %vm917_vm4, %v925_v49, %v933_v50  ;;  %v2957_v23 = vld [vmem:[%s3453_s18 + $0x20] sm:$0xff] }
 0x124   : > { %881 = vrot.lane.b32.xlu2 %v880_v37, %s3260_s16  ;;  %935 = vrot.lane.b32.xlu0 %v934_v58, %s3262_s12  ;;  %v862_v0 = vrot.slane %v860_v55, 1 }
 0x125   : > { %v901_v54 = vor.u32 %v900_v44, %v897_v43  ;;  %1145 = vmatpush.bf16.msra.mxu1 %v2959_v19 }
 0x126   : > { %v863_v7 = vsel %vm851_vm6, %v858_v5, %v862_v0  ;;  %v866_v15 = vor.u32 %v864_v14, %v862_v0  ;;  %1165 = vmatpush.bf16.msra.mxu2 %v2966_v20 }
 0x127   : > { %v902_v62 = vsel %vm885_vm5, %v893_v59, %v901_v54 }
 0x129   : > { %1146 = vmatpush.bf16.msra.mxu1 %v2958_v21 }
 0x12a   : > { %1166 = vmatpush.bf16.msra.mxu2 %v2965_v22 }
 0x12b   : > { %867 = vrot.lane.b32.xlu1 %v863_v7, %s3262_s12 }
 0x12c   : > { %903 = vrot.lane.b32.xlu2 %v902_v62, %s3261_s19  ;;  %951 = vrot.lane.b32.xlu0 %v948_v10, %s3260_s16 }
 0x12d   : > { %1147 = vmatpush.bf16.msra.mxu1 %v2957_v23 }
 0x12e   : > { %1167 = vmatpush.bf16.msra.mxu2 %v2964_v24 }
 0x131   : > { %1148 = vmatpush.bf16.msra.mxu1 %v2956_v25 }
 0x132   : > { %1168 = vmatpush.bf16.msra.mxu2 %v2963_v26 }
 0x133   : > { %953 = vrot.lane.b32.xlu1 %v950_v4, %s3260_s16 }
 0x134   : > { %979 = vrot.lane.b32.xlu2 %v976_v11, %s3261_s19  ;;  %937 = vrot.lane.b32.xlu0 %v933_v50, %s3262_s12 }
 0x135   : > { %1149 = vmatpush.bf16.msra.mxu1 %v2955_v27 }
 0x136   : > { %1169 = vmatpush.bf16.msra.mxu2 %v2962_v28 }
 0x13a   : > { %1170 = vmatpush.bf16.msra.mxu2 %v2961_v30 }
 0x13b   : > { %883 = vrot.lane.b32.xlu1 %v879_v29, %s3260_s16  ;;  %v2954_v29 = vld [vmem:[%s3453_s18 + $0x8] sm:$0xff]  ;;  %s2499_s18 = sshll.u32 %s3965_s25, 1 }
 0x13c   : > { %905 = vrot.lane.b32.xlu2 %v901_v54, %s3261_s19  ;;  %869 = vrot.lane.b32.xlu0 %v866_v15, %s3262_s12  ;;  %s3955_s19 = sld [smem:[#allocation20_spill]]  ;;  %s660_s30 = scalar_lea.vmem %s3958_s10, %s2499_s18 }
 0x13d   : > { %1150 = vmatpush.bf16.msra.mxu1 %v2954_v29 }
 0x141   : > { %1151 = vmatpush.bf16.msra.mxu1 %v2953_v31 }
 0x142   : > { %s3813_s12 = scalar_lea.vmem %s3955_s19, %s2948_s20 }
 0x17e   : > { %v882_v32 = vpop.permute.xlu2 %881 }
 0x186   : > { %v904_v35 = vpop.permute.xlu2 %903 }
 0x18e   : > { %v980_v46 = vpop.permute.xlu2 %979 }
 0x195   : > { %v978_v33 = vpop.permute.xlu1 %977 }
 0x196   : > { %v936_v34 = vpop.permute.xlu0 %935  ;;  %v906_v53 = vpop.permute.xlu2 %905 }
 0x197   : > { %v998_v38 = vsel %vm662_vm0, %v3543_v57, %v936_v34  ;;  %v1221_v34 = vld [vmem:[#allocation6 + $0xc] sm:$0x1] }
 0x19d   : > { %v868_v37 = vpop.permute.xlu1 %867 }
 0x19e   : > { %v982_v39 = vsel %vm662_vm0, %v3507_v56, %v868_v37  ;;  %v952_v40 = vpop.permute.xlu0 %951 }
 0x19f   : > { %v1003_v41 = vsel %vm667_vm8, %v998_v38, %v952_v40  ;;  %v986_v42 = vsel %vm667_vm8, %v982_v39, %v882_v32  ;;  %v1223_v32 = vld [vmem:[#allocation6 + $0xc] sm:$0x3]  ;;  %v2983_v40 = vld [vmem:[%s3461_s23 + $0x70] sm:$0xff] }
 0x1a0   : > { %v1007_v43 = vsel %vm989_vm9, %v1003_v41, %v978_v33  ;;  %v991_v44 = vsel %vm989_vm9, %v986_v42, %v904_v35  ;;  %v2984_v35 = vld [vmem:[%s3461_s23 + $0x78] sm:$0xff]  ;;  %v1314_v42 = vunpack.c.l.b16 %v1223_v32 }
 0x1a1   : > { %1171 = vmatmul.bf16.vlgmr.msra.gmra.mxu2 %v1007_v43  ;;  %1152 = vmatmul.bf16.vlgmr.msra.gmra.mxu1 %v991_v44  ;;  %v2976_v38 = vld [vmem:[%s3461_s23 + $0x38] sm:$0xff]  ;;  %v1284_v43 = vunpack.c.l.b16 %v1221_v34  ;;  %v2975_v44 = vld [vmem:[%s3461_s23 + $0x30] sm:$0xff] }
 0x1a2   : > { %1649 = vmatpush.bf16.msrb.mxu0 %v2984_v35  ;;  %1631 = vmatpush.bf16.msra.mxu3 %v2976_v38 }
 0x1a5   : > { %v954_v45 = vpop.permute.xlu1 %953 }
 0x1a6   : > { %v938_v48 = vpop.permute.xlu0 %937  ;;  %1650 = vmatpush.bf16.msrb.mxu0 %v2983_v40  ;;  %1632 = vmatpush.bf16.msra.mxu3 %v2975_v44  ;;  %v2974_v44 = vld [vmem:[%s3461_s23 + $0x28] sm:$0xff] }
 0x1a7   : > { %v1001_v49 = vsel %vm662_vm0, %v915_v47, %v938_v48 }
 0x1a8   : > { %v1005_v56 = vsel %vm667_vm8, %v1001_v49, %v954_v45 }
 0x1a9   : > { %v1010_v54 = vsel %vm989_vm9, %v1005_v56, %v980_v46 }
 0x1aa   : > { %1633 = vmatpush.bf16.msra.mxu3 %v2974_v44 }
 0x1ad   : > { %v884_v50 = vpop.permute.xlu1 %883 }
 0x1ae   : > { %v870_v51 = vpop.permute.xlu0 %869 }
 0x1af   : > { %v984_v52 = vsel %vm662_vm0, %v3529_v36, %v870_v51  ;;  %v3123_v36 = vld [vmem:[%s636_s14] ss:$0 sm:$0xff]  ;;  %vm1202_vm0 = vcmask 523265   ;;  %s651_s14 = scalar_lea.vmem %s3956_s29, %s3965_s25 }
 0x1b0   : > { %v988_v55 = vsel %vm667_vm8, %v984_v52, %v884_v50 }
 0x1b1   : > { %1176 = vmatmul.bf16.gmra.mxu2 %v1010_v54  ;;  %v994_v57 = vsel %vm989_vm9, %v988_v55, %v906_v53  ;;  %v2982_v55 = vld [vmem:[%s3461_s23 + $0x68] sm:$0xff] }
 0x1b2   : > { %1157 = vmatmul.bf16.gmra.mxu1 %v994_v57  ;;  %1651 = vmatpush.bf16.msrb.mxu0 %v2982_v55  ;;  %v2989_v55 = vld [vmem:[%s3461_s23 + $0xa0] sm:$0xff] }
 0x21e   : > { %v1153_v12 = vpop.f32.mrf.mxu1 }
 0x21f   : > { %v1154_v47 = vadd.f32 %v3123_v36, %v1153_v12 }
 0x224   : > { %v1172_v58 = vpop.f32.mrf.mxu2 }
 0x225   : > { %v1173_v59 = vadd.f32 %v1172_v58, %v1154_v47 }
 0x226   : > { %v1155_v60 = vpop.f32.mrf.mxu1 }
 0x227   : > { %v1182_v61 = vmax.f32 %v1173_v59, 0.0  ;;  %v1156_v62 = vadd.f32 %v3123_v36, %v1155_v60 }
 0x229   : > { %1186 = vst.msk [vmem:[#allocation3 + $0x1] sm:$0xff] %vm667_vm8, %v1182_v61 }
 0x22c   : > { %v1174_v63 = vpop.f32.mrf.mxu2 }
 0x22d   : > { %v1175_v0 = vadd.f32 %v1174_v63, %v1156_v62 }
 0x22f   : > { %v1183_v1 = vmax.f32 %v1175_v0, 0.0  ;;  %v1158_v2 = vpop.f32.mrf.mxu1 }
 0x230   : > { %v1159_v8 = vadd.f32 %v3123_v36, %v1158_v2 }
 0x231   : > { %1187 = vst.msk [vmem:[#allocation3 + $0x9] sm:$0x3] %vm683_vm11, %v1183_v1 }
 0x234   : > { %v1177_v5 = vpop.f32.mrf.mxu2 }
 0x235   : > { %v1178_v6 = vadd.f32 %v1177_v5, %v1159_v8 }
 0x237   : > { %v1184_v7 = vmax.f32 %v1178_v6, 0.0  ;;  %v1160_v11 = vpop.f32.mrf.mxu1 }
 0x238   : > { %v1188_v9 = vld [vmem:[#allocation3] ss:$2 sm:$0x3f]  ;;  %v1190_v10 = vld [vmem:[#allocation3 + $0x1] ss:$2 sm:$0x3f]  ;;  %v1161_v14 = vadd.f32 %v3123_v36, %v1160_v11 }
 0x239   : > { %v1191_v13 = vmax.f32 %v1188_v9, %v1190_v10  ;;  %1203 = vst.msk [vmem:[#allocation3] sm:$0xfe] %vm1202_vm0, %v1184_v7  ;;  %v2981_v7 = vld [vmem:[%s3461_s23 + $0x60] sm:$0xff] }
 0x23a   : > { %1652 = vmatpush.bf16.msrb.mxu0 %v2981_v7  ;;  %v2994_v7 = vld [vmem:[%s3461_s23 + $0xc8] sm:$0xff] }
 0x23b   : > { %v1192_v4 = vpack.c.bf16 %v1191_v13, %v1191_v13 }
 0x23c   : > { %v1179_v15 = vpop.f32.mrf.mxu2 }
 0x23d   : > { %v1194_v16 = vrot.slane %v1192_v4, 6  ;;  %v1180_v17 = vadd.f32 %v1179_v15, %v1161_v14 }
 0x23f   : > { %v1195_v18 = vrot.slane %v1194_v16, 4  ;;  %1199 = vst.msk [vmem:[#allocation6] sm:$0xc] %vm1198_vm12, %v1194_v16  ;;  %v1185_v19 = vmax.f32 %v1180_v17, 0.0 }
 0x241   : > { %1201 = vst.msk [vmem:[#allocation6 + $0x4] sm:$0x1] %vm1200_vm13, %v1195_v18 }
 0x242   : > { %1205 = vst.msk [vmem:[#allocation3 + $0x8] sm:$0x7] %vm1204_vm14, %v1185_v19 }
 0x246   : > { %v1218_v26 = vld [vmem:[#allocation6] sm:$0xe] }
 0x247   : > { %v1222_v28 = vld [vmem:[#allocation6] sm:$0x8]  ;;  %v1253_v29 = vunpack.c.l.b16 %v1218_v26 }
 0x248   : > { %v3619_v24 = vld [vmem:[#allocation6] sm:$0xff]   ;;  %v1313_v33 = vunpack.c.l.b16 %v1222_v28 }
 0x249   : > { %v1206_v20 = vld [vmem:[#allocation3] ss:$2 sm:$0x3f]  ;;  %v1207_v21 = vld [vmem:[#allocation3 + $0x1] ss:$2 sm:$0x3f]  ;;  %v3056_v27 = vunpack.c.h.b16 %v3619_v24 }
 0x24a   : > { %v1208_v22 = vmax.f32 %v1206_v20, %v1207_v21  ;;  %v1235_v30 = vshll.u32 %v3619_v24, 16  ;;  %v1220_v37 = vld [vmem:[#allocation6] sm:$0xc]  ;;  %v1233_v52 = vshrl.u32 %v3619_v24, 16 }
 0x24b   : > { %v3623_v31 = vpack.c.b16 %v3056_v27, %v1253_v29  ;;  %v3627_v39 = vpack.c.b16 %v3056_v27, %v1313_v33  ;;  %v1283_v50 = vunpack.c.l.b16 %v1220_v37 }
 0x24c   : > { %v1209_v23 = vpack.c.bf16 %v1208_v22, %v1208_v22  ;;  %v1237_v41 = vrot.slane %v1235_v30, 1 }
 0x24d   : > { %v1261_v48 = vshrl.u32 %v3623_v31, 16  ;;  %v1264_v49 = vshll.u32 %v3623_v31, 16  ;;  %v1321_v53 = vshrl.u32 %v3627_v39, 16  ;;  %v1285_v54 = vpack.c.b16 %v3056_v27, %v1283_v50  ;;  %v2979_v50 = vld [vmem:[%s3461_s23 + $0x50] sm:$0xff] }
 0x24e   : > { %v1211_v25 = vrot.slane %v1209_v23, 7  ;;  %v1238_v58 = vor.u32 %v1237_v41, %v1233_v52  ;;  %v1324_v61 = vshll.u32 %v3627_v39, 16  ;;  %v1317_v1 = vrot.slane %v3627_v39, 3  ;;  %v3000_v52 = vld [vmem:[%s3461_s23 + $0xf8] sm:$0xff] }
 0x24f   : > { %v1263_v59 = vrot.slane %v1261_v48, 1  ;;  %v1266_v60 = vrot.slane %v1264_v49, 2  ;;  %v1291_v14 = vshrl.u32 %v1285_v54, 16  ;;  %v1294_v15 = vshll.u32 %v1285_v54, 16  ;;  %v2973_v48 = vld [vmem:[%s3461_s23 + $0x20] sm:$0xff]  ;;  %v2991_v49 = vld [vmem:[%s3461_s23 + $0xb0] sm:$0xff]  ;;  %3057 = vmatpush.bf16.msrb.mxu2 %v3000_v52 }
 0x250   : > { %1214 = vst.msk [vmem:[#allocation6 + $0x8] sm:$0xe] %vm1213_vm15, %v1211_v25  ;;  %v1257_v16 = vrot.slane %v3623_v31, 1  ;;  %v1287_v20 = vrot.slane %v1285_v54, 2  ;;  %v1323_v29 = vrot.slane %v1321_v53, 3  ;;  %v1326_v30 = vrot.slane %v1324_v61, 4  ;;  %1634 = vmatpush.bf16.msra.mxu3 %v2973_v48 }
 0x251   : > { %v1267_v4 = vor.u32 %v1266_v60, %v1263_v59  ;;  %v1293_v33 = vrot.slane %v1291_v14, 2  ;;  %v1296_v34 = vrot.slane %v1294_v15, 3  ;;  %v2971_v53 = vld [vmem:[%s3461_s23 + $0x10] sm:$0xff]  ;;  %v2978_v54 = vld [vmem:[%s3461_s23 + $0x48] sm:$0xff]  ;;  %v2977_v60 = vld [vmem:[%s3461_s23 + $0x40] sm:$0xff] }
 0x252   : > { %v1327_v40 = vor.u32 %v1326_v30, %v1323_v29  ;;  %v2970_v59 = vld [vmem:[%s3461_s23 + $0x8] sm:$0xff]  ;;  %v2988_v61 = vld [vmem:[%s3461_s23 + $0x98] sm:$0xff] }
 0x253   : > { %v1297_v41 = vor.u32 %v1296_v34, %v1293_v33 }
 0x257   : > { %v1217_v45 = vld [vmem:[#allocation6 + $0x8] sm:$0x7] }
 0x258   : > { %v1219_v46 = vld [vmem:[#allocation6 + $0x8] sm:$0xf]  ;;  %v1229_v56 = vunpack.c.l.b16 %v1217_v45 }
 0x259   : > { %v1254_v51 = vunpack.c.l.b16 %v1219_v46  ;;  %v2980_v45 = vld [vmem:[%s3461_s23 + $0x58] sm:$0xff] }
 0x25a   : > { %v3636_v57 = vpack.c.b16 %v1229_v56, %v1229_v56  ;;  %v2992_v46 = vld [vmem:[%s3461_s23 + $0xb8] sm:$0xff]  ;;  %1653 = vmatpush.bf16.msrb.mxu0 %v2980_v45 }
 0x25b   : > { %v3638_v12 = vpack.c.b16 %v1254_v51, %v1254_v51  ;;  %v3640_v36 = vpack.c.b16 %v1314_v42, %v1254_v51  ;;  %v3642_v47 = vpack.c.b16 %v1284_v43, %v1254_v51  ;;  %1667 = vmatpush.bf16.msrb.mxu1 %v2992_v46  ;;  %v2972_v56 = vld [vmem:[%s3461_s23 + $0x18] sm:$0xff]  ;;  %v2990_v51 = vld [vmem:[%s3461_s23 + $0xa8] sm:$0xff] }
 0x25c   : > { %v1240_v62 = vshll.u32 %v3636_v57, 16  ;;  %v1244_v35 = vshrl.u32 %v3636_v57, 16  ;;  %1635 = vmatpush.bf16.msra.mxu3 %v2972_v56 }
 0x25d   : > { %v1269_v63 = vshrl.u32 %v3638_v12, 16  ;;  %v1272_v0 = vshll.u32 %v3638_v12, 16  ;;  %v1329_v2 = vshrl.u32 %v3640_v36, 16  ;;  %v1332_v8 = vshll.u32 %v3640_v36, 16 }
 0x25e   : > { %v1299_v5 = vshrl.u32 %v3642_v47, 16  ;;  %v1302_v6 = vshll.u32 %v3642_v47, 16  ;;  %v1242_v9 = vrot.slane %v1240_v62, 1  ;;  %v1318_v13 = vrot.slane %v3640_v36, 3  ;;  %1654 = vmatpush.bf16.msrb.mxu0 %v2979_v50  ;;  %v2998_v62 = vld [vmem:[%s3461_s23 + $0xe8] sm:$0xff] }
 0x25f   : > { %v1271_v10 = vrot.slane %v1269_v63, 1  ;;  %v1274_v11 = vrot.slane %v1272_v0, 2  ;;  %v1331_v21 = vrot.slane %v1329_v2, 3  ;;  %v1334_v22 = vrot.slane %v1332_v8, 4  ;;  %1668 = vmatpush.bf16.msrb.mxu1 %v2991_v49  ;;  %v2969_v63 = vld [vmem:[%s3461_s23] sm:$0xff]  ;;  %v2987_v0 = vld [vmem:[%s3461_s23 + $0x90] sm:$0xff] }
 0x260   : > { %v1243_v17 = vsel %vm851_vm6, %v1238_v58, %v1242_v9  ;;  %v3660_v19 = vsel %vm945_vm7, %v1317_v1, %v1318_v13  ;;  %v1258_v23 = vrot.slane %v3638_v12, 1  ;;  %v1288_v25 = vrot.slane %v3642_v47, 2  ;;  %v2999_v58 = vld [vmem:[%s3461_s23 + $0xf0] sm:$0xff]  ;;  %1636 = vmatpush.bf16.msra.mxu3 %v2971_v53  ;;  %v2997_v1 = vld [vmem:[%s3461_s23 + $0xe0] sm:$0xff]  ;;  %v2986_v2 = vld [vmem:[%s3461_s23 + $0x88] sm:$0xff] }
 0x261   : > { %v1275_v18 = vor.u32 %v1274_v11, %v1271_v10  ;;  %1247 = vrot.lane.b32.xlu1 %v1243_v17, %s3260_s16  ;;  %v1301_v27 = vrot.slane %v1299_v5, 2  ;;  %v1304_v28 = vrot.slane %v1302_v6, 3  ;;  %v1335_v37 = vor.u32 %v1334_v22, %v1331_v21  ;;  %3058 = vmatpush.bf16.msrb.mxu2 %v2999_v58  ;;  %v2996_v8 = vld [vmem:[%s3461_s23 + $0xd8] sm:$0xff]  ;;  %v2985_v5 = vld [vmem:[%s3461_s23 + $0x80] sm:$0xff]  ;;  %v2995_v6 = vld [vmem:[%s3461_s23 + $0xd0] sm:$0xff] }
 0x262   : > { %v3671_v31 = vsel %vm877_vm1, %v1257_v16, %v1258_v23  ;;  %v3676_v32 = vsel %vm913_vm3, %v1287_v20, %v1288_v25  ;;  %v1246_v39 = vor.u32 %v1244_v35, %v1242_v9  ;;  %1655 = vmatpush.bf16.msrb.mxu0 %v2978_v54  ;;  %v2993_v9 = vld [vmem:[%s3461_s23 + $0xc0] sm:$0xff]  ;;  %vm671_vm1 = vcmask 490496   ;;  %s2947_s23 = sshll.u32 %s3965_s25, 8 }
 0x263   : > { %1279 = vrot.lane.b32.xlu2 %v1275_v18, %s3260_s16  ;;  %v1276_v26 = vsel %vm885_vm5, %v1267_v4, %v1275_v18  ;;  %v1305_v38 = vor.u32 %v1304_v28, %v1301_v27  ;;  %v1336_v42 = vsel %vm955_vm2, %v1327_v40, %v1335_v37  ;;  %1669 = vmatpush.bf16.msrb.mxu1 %v2990_v51  ;;  %s3747_s27 = scalar_lea.vmem %s3927_s7, %s2947_s23  ;;  %vm1706_vm2 = vcmask 489472  }
 0x264   : > { %1277 = vrot.lane.b32.xlu0 %v1276_v26, %s3260_s16  ;;  %1637 = vmatpush.bf16.msra.mxu3 %v2970_v59  ;;  %672 = vst.msk [vmem:[#allocation4] sm:$0xff] %vm671_vm1, %v3258_v3  ;;  %v2743_v29 = vld [vmem:[%s3747_s27 + $0x60] sm:$0xf]  ;;  %v3014_v30 = vld [vmem:[%s3747_s27 + $0x64] sm:$0xf0]  ;;  %vm1714_vm5 = vcmask 490502  }
 0x265   : > { %v1306_v43 = vsel %vm917_vm4, %v1297_v41, %v1305_v38  ;;  %3059 = vmatpush.bf16.msrb.mxu2 %v2998_v62  ;;  %v2785_v33 = vld [vmem:[%s3747_s27 + $0x30] sm:$0xf]  ;;  %v3008_v34 = vld [vmem:[%s3747_s27 + $0x34] sm:$0x30]  ;;  %v3007_v35 = vld [vmem:[%s3747_s27 + $0x34] sm:$0xf]  ;;  %v2744_v44 = vor.u32 %v3014_v30, %v2743_v29 }
 0x266   : > { %1656 = vmatpush.bf16.msrb.mxu0 %v2977_v60  ;;  %v3012_v40 = vld [vmem:[%s3747_s27 + $0x54] sm:$0xf0]  ;;  %v2786_v41 = vor.u32 %v3008_v34, %v2785_v33  ;;  %v2777_v48 = vld [vmem:[%s3747_s27 + $0x20] sm:$0xf]  ;;  %v3006_v49 = vld [vmem:[%s3747_s27 + $0x24] sm:$0xf0] }
 0x267   : > { %1670 = vmatpush.bf16.msrb.mxu1 %v2989_v55  ;;  %v3024_v46 = vld [vmem:[%s3747_s27 + $0xb4] sm:$0x30]  ;;  %v3005_v51 = vld [vmem:[%s3747_s27 + $0x24] sm:$0xf]  ;;  %v2778_v55 = vor.u32 %v3006_v49, %v2777_v48  ;;  %v3022_v59 = vld [vmem:[%s3747_s27 + $0xa4] sm:$0xf0] }
 0x268   : > { %1638 = vmatpush.bf16.msra.mxu3 %v2969_v63  ;;  %v1875_v50 = vsel %vm913_vm3, %v2786_v41, 0  ;;  %v3010_v63 = vld [vmem:[%s3747_s27 + $0x44] sm:$0xf0]  ;;  %vm1716_vm4 = vcmask 487424   ;;  %vm1712_vm6 = vcmask 486400   ;;  %vm1753_vm7 = vcmask 1041409  }
 0x269   : > { %1249 = vrot.lane.b32.xlu1 %v1246_v39, %s3260_s16  ;;  %3060 = vmatpush.bf16.msrb.mxu2 %v2997_v1  ;;  %v2735_v39 = vld [vmem:[%s3747_s27 + $0x50] sm:$0xf] }
 0x26a   : > { %1685 = vmatpush.bf16.msra.mxu0 %v3000_v52  ;;  %v2779_v52 = vld [vmem:[%s3747_s27 + $0x28] sm:$0xf0] }
 0x26b   : > { %1337 = vrot.lane.b32.xlu2 %v1336_v42, %s3260_s16  ;;  %1671 = vmatpush.bf16.msrb.mxu1 %v2988_v61  ;;  %v2787_v42 = vld [vmem:[%s3747_s27 + $0x38] sm:$0x30]  ;;  %v2782_v61 = vor.u32 %v3005_v51, %v2779_v52  ;;  %v3031_v51 = vld [vmem:[%s3747_s27 + $0xf4] sm:$0xf] }
 0x26c   : > { %1307 = vrot.lane.b32.xlu0 %v1306_v43, %s3260_s16  ;;  %v2827_v43 = vld [vmem:[%s3747_s27 + $0xb0] sm:$0xf]  ;;  %v2790_v45 = vor.u32 %v3007_v35, %v2787_v42  ;;  %v3015_v42 = vld [vmem:[%s3747_s27 + $0x74] sm:$0xf] }
 0x26d   : > { %3061 = vmatpush.bf16.msrb.mxu2 %v2996_v8  ;;  %v2828_v56 = vor.u32 %v3024_v46, %v2827_v43  ;;  %v2753_v43 = vld [vmem:[%s3747_s27 + $0x78] sm:$0x30] }
 0x26e   : > { %1686 = vmatpush.bf16.msra.mxu0 %v2999_v58  ;;  %v1878_v54 = vsel %vm913_vm3, %v2790_v45, 0  ;;  %v2819_v58 = vld [vmem:[%s3747_s27 + $0xa0] sm:$0xf] }
 0x26f   : > { %1672 = vmatpush.bf16.msrb.mxu1 %v2987_v0  ;;  %v1961_v60 = vsel %vm913_vm3, %v2828_v56, 0  ;;  %v3032_v56 = vld [vmem:[%s3747_s27 + $0xf4] sm:$0x30] }
 0x271   : > { %1309 = vrot.lane.b32.xlu1 %v1305_v38, %s3260_s16  ;;  %3062 = vmatpush.bf16.msrb.mxu2 %v2995_v6 }
 0x272   : > { %1687 = vmatpush.bf16.msra.mxu0 %v2998_v62  ;;  %v2727_v62 = vld [vmem:[%s3747_s27 + $0x40] sm:$0xf] }
 0x273   : > { %1673 = vmatpush.bf16.msrb.mxu1 %v2986_v2  ;;  %v2820_v2 = vor.u32 %v3022_v59, %v2819_v58  ;;  %v2745_v58 = vld [vmem:[%s3747_s27 + $0x68] sm:$0xf0]  ;;  %v2861_v59 = vld [vmem:[%s3747_s27 + $0xe0] sm:$0xf] }
 0x274   : > { %1339 = vrot.lane.b32.xlu0 %v1335_v37, %s3260_s16  ;;  %v3767_v37 = vld [vmem:[%s639_s26] ss:$0 sm:$0xff]  ;;  %s648_s26 = scalar_lea.vmem %s3957_s13, %s2499_s18 }
 0x275   : > { %3063 = vmatpush.bf16.msrb.mxu2 %v2994_v7 }
 0x276   : > { %1688 = vmatpush.bf16.msra.mxu0 %v2997_v1  ;;  %v2736_v1 = vor.u32 %v3012_v40, %v2735_v39 }
 0x277   : > { %1674 = vmatpush.bf16.msrb.mxu1 %v2985_v5  ;;  %v3004_v5 = vld [vmem:[%s3747_s27 + $0x14] sm:$0xf0] }
 0x279   : > { %3064 = vmatpush.bf16.msrb.mxu2 %v2993_v9 }
 0x27a   : > { %1689 = vmatpush.bf16.msra.mxu0 %v2996_v8  ;;  %v2769_v8 = vld [vmem:[%s3747_s27 + $0x10] sm:$0xf] }
 0x27b   : > { %1897 = vmatpush.bf16.msra.mxu1 %v1878_v54  ;;  %v3013_v54 = vld [vmem:[%s3747_s27 + $0x64] sm:$0xf] }
 0x27d   : > { %1970 = vmatpush.bf16.msra.mxu2 %v1961_v60  ;;  %v3030_v60 = vld [vmem:[%s3747_s27 + $0xe4] sm:$0xf0] }
 0x27e   : > { %1690 = vmatpush.bf16.msra.mxu0 %v2995_v6  ;;  %v3003_v6 = vld [vmem:[%s3747_s27 + $0x14] sm:$0xf] }
 0x27f   : > { %1898 = vmatpush.bf16.msra.mxu1 %v2782_v61 }
 0x281   : > { %1971 = vmatpush.bf16.msra.mxu2 %v2820_v2  ;;  %v2862_v2 = vor.u32 %v3030_v60, %v2861_v59 }
 0x282   : > { %1691 = vmatpush.bf16.msra.mxu0 %v2994_v7 }
 0x286   : > { %1692 = vmatpush.bf16.msra.mxu0 %v2993_v9  ;;  %v2771_v9 = vld [vmem:[%s3747_s27 + $0x18] sm:$0xf0] }
 0x2bd   : > { %v1280_v18 = vpop.permute.xlu2 %1279 }
 0x2be   : > { %v1353_v21 = vsel %vm667_vm8, %v1258_v23, %v1280_v18  ;;  %v3016_v23 = vld [vmem:[%s3747_s27 + $0x74] sm:$0x30]  ;;  %v3002_v18 = vld [vmem:[%s3747_s27 + $0x4] sm:$0xf0] }
 0x2d3   : > { %v1248_v10 = vpop.permute.xlu1 %1247 }
 0x2d4   : > { %v1342_v11 = vsel %vm667_vm8, %v3619_v24, %v1248_v10  ;;  %v2811_v10 = vld [vmem:[%s3747_s27 + $0x90] sm:$0xf] }
 0x2d5   : > { %1639 = vmatmul.bf16.vlgmr.msra.gmra.mxu3 %v1342_v11  ;;  %v3020_v11 = vld [vmem:[%s3747_s27 + $0x94] sm:$0xf0] }
 0x2d6   : > { %v1278_v4 = vpop.permute.xlu0 %1277 }
 0x2d7   : > { %v1349_v14 = vsel %vm667_vm8, %v3671_v31, %v1278_v4 }
 0x2d8   : > { %1657 = vmatmul.bf16.vlgmr.msrb.gmra.mxu0 %v1349_v14 }
 0x2d9   : > { %1884 = vmatpush.bf16.msrb.mxu0 %v1875_v50  ;;  %v2869_v50 = vld [vmem:[%s3747_s27 + $0xf0] sm:$0xf] }
 0x2da   : > { %v2870_v52 = vor.u32 %v3032_v56, %v2869_v50  ;;  %v3019_v50 = vld [vmem:[%s3747_s27 + $0x94] sm:$0xf]  ;;  %v2813_v56 = vld [vmem:[%s3747_s27 + $0x98] sm:$0xf0] }
 0x2db   : > { %v1250_v17 = vpop.permute.xlu1 %1249 }
 0x2dc   : > { %v1345_v24 = vsel %vm667_vm8, %v3636_v57, %v1250_v17  ;;  %v1338_v57 = vpop.permute.xlu2 %1337  ;;  %v2761_v17 = vld [vmem:[%s3747_s27] sm:$0xf]  ;;  %v2049_v61 = vsel %vm913_vm3, %v2870_v52, 0  ;;  %v2816_v52 = vor.u32 %v3019_v50, %v2813_v56 }
 0x2dd   : > { %v1365_v28 = vsel %vm667_vm8, %v3660_v19, %v1338_v57  ;;  %v2751_v19 = vld [vmem:[%s3747_s27 + $0x70] sm:$0xf]  ;;  %1885 = vmatpush.bf16.msrb.mxu0 %v2778_v55  ;;  %v2803_v57 = vld [vmem:[%s3747_s27 + $0x80] sm:$0xf] }
 0x2de   : > { %v1308_v15 = vpop.permute.xlu0 %1307 }
 0x2df   : > { %v1357_v16 = vsel %vm667_vm8, %v3676_v32, %v1308_v15  ;;  %v2770_v15 = vor.u32 %v3004_v5, %v2769_v8  ;;  %v3011_v8 = vld [vmem:[%s3747_s27 + $0x54] sm:$0xf]  ;;  %v2737_v5 = vld [vmem:[%s3747_s27 + $0x58] sm:$0xf0] }
 0x2e0   : > { %1675 = vmatmul.bf16.vlgmr.msrb.gmra.mxu1 %v1357_v16  ;;  %v2774_v16 = vor.u32 %v3003_v6, %v2771_v9  ;;  %v2853_v9 = vld [vmem:[%s3747_s27 + $0xd0] sm:$0xf] }
 0x2e1   : > { %1886 = vmatpush.bf16.msrb.mxu0 %v2770_v15  ;;  %v2729_v15 = vld [vmem:[%s3747_s27 + $0x48] sm:$0xf0] }
 0x2e2   : > { %1899 = vmatpush.bf16.msra.mxu1 %v2774_v16 }
 0x2e3   : > { %v1310_v26 = vpop.permute.xlu1 %1309 }
 0x2e4   : > { %v1361_v27 = vsel %vm667_vm8, %v1288_v25, %v1310_v26  ;;  %v2752_v25 = vor.u32 %v3016_v23, %v2751_v19  ;;  %v2762_v19 = vor.u32 %v3002_v18, %v2761_v17 }
 0x2e5   : > { %1644 = vmatmul.bf16.gmra.mxu3 %v1345_v24  ;;  %v2728_v24 = vor.u32 %v3010_v63, %v2727_v62  ;;  %v2748_v62 = vor.u32 %v3013_v54, %v2745_v58  ;;  %v3029_v63 = vld [vmem:[%s3747_s27 + $0xe4] sm:$0xf]  ;;  %v2805_v54 = vld [vmem:[%s3747_s27 + $0x88] sm:$0xf0] }
 0x2e6   : > { %v1340_v20 = vpop.permute.xlu0 %1339  ;;  %v1799_v38 = vsel %vm913_vm3, %v2752_v25, 0  ;;  %1887 = vmatpush.bf16.msrb.mxu0 %v2762_v19 }
 0x2e7   : > { %v1369_v22 = vsel %vm667_vm8, %v1318_v13, %v1340_v20  ;;  %1808 = vmatpush.bf16.msrb.mxu3 %v1799_v38  ;;  %v2812_v20 = vor.u32 %v3020_v11, %v2811_v10  ;;  %v3028_v10 = vld [vmem:[%s3747_s27 + $0xd4] sm:$0xf0]  ;;  %v3027_v11 = vld [vmem:[%s3747_s27 + $0xd4] sm:$0xf] }
 0x2e8   : > { %1662 = vmatmul.bf16.gmra.mxu0 %v1353_v21  ;;  %1698 = vmatmul.bf16.vlgmr.msrb.gmra.mxu2 %v1369_v22  ;;  %v3001_v21 = vld [vmem:[%s3747_s27 + $0x4] sm:$0xf]  ;;  %v2763_v22 = vld [vmem:[%s3747_s27 + $0x8] sm:$0xf0] }
 0x2e9   : > { %v2766_v23 = vor.u32 %v3001_v21, %v2763_v22  ;;  %1972 = vmatpush.bf16.msra.mxu2 %v2812_v20  ;;  %v2854_v20 = vor.u32 %v3028_v10, %v2853_v9  ;;  %v3045_v9 = vld [vmem:[%s3857_s11 + $0x60] sm:$0xff] }
 0x2eb   : > { %1809 = vmatpush.bf16.msrb.mxu3 %v2744_v44  ;;  %1900 = vmatpush.bf16.msra.mxu1 %v2766_v23  ;;  %v2756_v44 = vor.u32 %v3015_v42, %v2753_v43  ;;  %v3021_v43 = vld [vmem:[%s3747_s27 + $0xa4] sm:$0xf] }
 0x2ed   : > { %v1802_v49 = vsel %vm913_vm3, %v2756_v44, 0  ;;  %v2821_v44 = vld [vmem:[%s3747_s27 + $0xa8] sm:$0xf0] }
 0x2ef   : > { %1810 = vmatpush.bf16.msrb.mxu3 %v2736_v1 }
 0x2f0   : > { %1680 = vmatmul.bf16.gmra.mxu1 %v1361_v27 }
 0x2f3   : > { %1811 = vmatpush.bf16.msrb.mxu3 %v2728_v24 }
 0x2f7   : > { %1821 = vmatpush.bf16.msra.mxu3 %v1802_v49  ;;  %v2824_v49 = vor.u32 %v3021_v43, %v2821_v44 }
 0x2f8   : > { %1693 = vmatmul.bf16.vlgmr.msra.gmra.mxu0 %v1365_v28  ;;  %v3018_v28 = vld [vmem:[%s3747_s27 + $0x84] sm:$0xf0] }
 0x2f9   : > { %v2804_v29 = vor.u32 %v3018_v28, %v2803_v57  ;;  %2058 = vmatpush.bf16.msra.mxu0 %v2049_v61  ;;  %v3025_v28 = vld [vmem:[%s3747_s27 + $0xc4] sm:$0xf] }
 0x2fb   : > { %1973 = vmatpush.bf16.msra.mxu2 %v2804_v29  ;;  %1822 = vmatpush.bf16.msra.mxu3 %v2748_v62  ;;  %v3038_v62 = vld [vmem:[%s3857_s11 + $0x28] sm:$0xff] }
 0x2fd   : > { %2059 = vmatpush.bf16.msra.mxu0 %v2862_v2  ;;  %v3048_v2 = vld [vmem:[%s3857_s11 + $0x78] sm:$0xff] }
 0x301   : > { %2060 = vmatpush.bf16.msra.mxu0 %v2854_v20 }
 0x355   : > { %v3735_v12 = vpop.f32.mrf.mxu0 }
 0x358   : > { %v1640_v36 = vpop.f32.mrf.mxu3 }
 0x359   : > { %v1641_v7 = vadd.f32 %v3767_v37, %v1640_v36 }
 0x35b   : > { %v1659_v26 = vadd.f32 %v3735_v12, %v1641_v7  ;;  %v2740_v7 = vor.u32 %v3011_v8, %v2737_v5  ;;  %v3034_v8 = vld [vmem:[%s3857_s11 + $0x8] sm:$0xff]  ;;  %v3047_v5 = vld [vmem:[%s3857_s11 + $0x70] sm:$0xff] }
 0x35d   : > { %v3740_v13 = vpop.f32.mrf.mxu0  ;;  %v3742_v47 = vpop.f32.mrf.mxu1  ;;  %1823 = vmatpush.bf16.msra.mxu3 %v2740_v7  ;;  %v3046_v7 = vld [vmem:[%s3857_s11 + $0x68] sm:$0xff] }
 0x35e   : > { %v1677_v30 = vadd.f32 %v3742_v47, %v1659_v26  ;;  %v2845_v26 = vld [vmem:[%s3747_s27 + $0xc0] sm:$0xf] }
 0x360   : > { %v3749_v3 = vpop.f32.mrf.mxu3 }
 0x361   : > { %v1643_v33 = vadd.f32 %v3767_v37, %v3749_v3 }
 0x363   : > { %v1661_v39 = vadd.f32 %v3740_v13, %v1643_v33 }
 0x365   : > { %v3755_v31 = vpop.f32.mrf.mxu0  ;;  %v3757_v32 = vpop.f32.mrf.mxu1 }
 0x366   : > { %v1679_v47 = vadd.f32 %v3757_v32, %v1661_v39 }
 0x368   : > { %v1645_v53 = vpop.f32.mrf.mxu3 }
 0x369   : > { %v1646_v27 = vadd.f32 %v3767_v37, %v1645_v53  ;;  %v2871_v53 = vld [vmem:[%s3747_s27 + $0xf8] sm:$0x30] }
 0x36a   : > { %v2874_v55 = vor.u32 %v3031_v51, %v2871_v53  ;;  %v3039_v51 = vld [vmem:[%s3857_s11 + $0x30] sm:$0xff] }
 0x36b   : > { %v1699_v0 = vpop.f32.mrf.mxu2  ;;  %v1664_v12 = vadd.f32 %v3755_v31, %v1646_v27  ;;  %v3026_v27 = vld [vmem:[%s3747_s27 + $0xc4] sm:$0xf0]  ;;  %v3017_v53 = vld [vmem:[%s3747_s27 + $0x84] sm:$0xf] }
 0x36c   : > { %v2052_v1 = vsel %vm913_vm3, %v2874_v55, 0  ;;  %v2846_v19 = vor.u32 %v3026_v27, %v2845_v26  ;;  %v2808_v58 = vor.u32 %v3017_v53, %v2805_v54  ;;  %v3041_v26 = vld [vmem:[%s3857_s11 + $0x40] sm:$0xff] }
 0x36d   : > { %v1665_v4 = vpop.f32.mrf.mxu0  ;;  %v1681_v14 = vpop.f32.mrf.mxu1  ;;  %2071 = vmatpush.bf16.msrb.mxu1 %v2052_v1  ;;  %v3035_v1 = vld [vmem:[%s3857_s11 + $0x10] sm:$0xff] }
 0x36e   : > { %v1682_v40 = vadd.f32 %v1681_v14, %v1664_v12  ;;  %v2855_v4 = vld [vmem:[%s3747_s27 + $0xd8] sm:$0xf0]  ;;  %v3009_v14 = vld [vmem:[%s3747_s27 + $0x44] sm:$0xf]  ;;  %2061 = vmatpush.bf16.msra.mxu0 %v2846_v19  ;;  %v3023_v12 = vld [vmem:[%s3747_s27 + $0xb4] sm:$0xf] }
 0x36f   : > { %v2858_v21 = vor.u32 %v3027_v11, %v2855_v4  ;;  %v2732_v22 = vor.u32 %v3009_v14, %v2729_v15  ;;  %v3044_v4 = vld [vmem:[%s3857_s11 + $0x58] sm:$0xff]  ;;  %v3043_v15 = vld [vmem:[%s3857_s11 + $0x50] sm:$0xff] }
 0x370   : > { %v1647_v36 = vpop.f32.mrf.mxu3  ;;  %v1700_v3 = vadd.f32 %v1699_v0, %v1682_v40  ;;  %v2863_v0 = vld [vmem:[%s3747_s27 + $0xe8] sm:$0xf0] }
 0x371   : > { %v2866_v6 = vor.u32 %v3029_v63, %v2863_v0  ;;  %v2847_v36 = vld [vmem:[%s3747_s27 + $0xc8] sm:$0xf0]  ;;  %1824 = vmatpush.bf16.msra.mxu3 %v2732_v22  ;;  %v3037_v63 = vld [vmem:[%s3857_s11 + $0x20] sm:$0xff]  ;;  %v2082_v22 = vld [vmem:[%s648_s26] sm:$0x3] }
 0x372   : > { %v1705_v45 = vmax.f32 %v1700_v3, 0.0  ;;  %v2850_v23 = vor.u32 %v3025_v28, %v2847_v36  ;;  %v3036_v0 = vld [vmem:[%s3857_s11 + $0x18] sm:$0xff]  ;;  %v2084_v28 = vperm.slane %v2082_v22, 0 }
 0x373   : > { %v1701_v25 = vpop.f32.mrf.mxu2  ;;  %2072 = vmatpush.bf16.msrb.mxu1 %v2866_v6  ;;  %v3033_v6 = vld [vmem:[%s3857_s11] sm:$0xff] }
 0x375   : > { %v1683_v34 = vpop.f32.mrf.mxu1  ;;  %v1694_v35 = vpop.f32.mrf.mxu0 }
 0x376   : > { %v1695_v38 = vadd.f32 %v1694_v35, %v1677_v30  ;;  %v2829_v34 = vld [vmem:[%s3747_s27 + $0xb8] sm:$0x30] }
 0x377   : > { %2073 = vmatpush.bf16.msrb.mxu1 %v2858_v21 }
 0x378   : > { %v1703_v41 = vmax.f32 %v1695_v38, 0.0  ;;  %v2832_v38 = vor.u32 %v3023_v12, %v2829_v34 }
 0x37a   : > { %1707 = vst.msk [vmem:[#allocation4 + $0x1] sm:$0x7f] %vm1706_vm2, %v1703_v41  ;;  %v1964_v42 = vsel %vm913_vm3, %v2832_v38, 0 }
 0x37b   : > { %2074 = vmatpush.bf16.msrb.mxu1 %v2850_v23 }
 0x37d   : > { %v1696_v37 = vpop.f32.mrf.mxu0 }
 0x37e   : > { %v1697_v31 = vadd.f32 %v1696_v37, %v1679_v47 }
 0x380   : > { %v1704_v46 = vmax.f32 %v1697_v31, 0.0 }
 0x381   : > { %v1708_v13 = vld [vmem:[#allocation4] ss:$2 sm:$0xf]  ;;  %v1710_v32 = vld [vmem:[#allocation4 + $0x1] ss:$2 sm:$0xf] }
 0x382   : > { %v1711_v48 = vmax.f32 %v1708_v13, %v1710_v32  ;;  %1717 = vst.msk [vmem:[#allocation4 + $0x3] sm:$0x1f] %vm1716_vm4, %v1705_v45 }
 0x383   : > { %1715 = vst.msk [vmem:[#allocation4 - $0x5] sm:$0xc0] %vm1714_vm5, %v1704_v46 }
 0x384   : > { %1713 = vst.msk [vmem:[%s3813_s12] sm:$0xf] %vm1712_vm6, %v1711_v48  ;;  %v3040_v48 = vld [vmem:[%s3857_s11 + $0x38] sm:$0xff] }
 0x385   : > { %2226 = vmatpush.bf16.msrb.mxu2 %v3040_v48 }
 0x389   : > { %2227 = vmatpush.bf16.msrb.mxu2 %v3039_v51 }
 0x38a   : > { %v1718_v16 = vld [vmem:[#allocation4] ss:$2 sm:$0xf]  ;;  %v1719_v17 = vld [vmem:[#allocation4 + $0x1] ss:$2 sm:$0xf] }
 0x38b   : > { %v1720_v18 = vmax.f32 %v1718_v16, %v1719_v17  ;;  %v1723_v24 = vld [vmem:[%s3813_s12] sm:$0xf] }
 0x38c   : > { %v1725_v57 = vpack.c.bf16 %v1723_v24, %v1723_v24  ;;  %v3042_v24 = vld [vmem:[%s3857_s11 + $0x48] sm:$0xff] }
 0x38d   : > { %2714 = vst.msk [vmem:[%s3813_s12 + $0x4] sm:$0xf] %vm1712_vm6, %v1720_v18  ;;  %2228 = vmatpush.bf16.msrb.mxu2 %v3038_v62 }
 0x38e   : > { %v1746_v25 = vunpack.c.l.b16 %v1725_v57 }
 0x390   : > { %v2723_v33 = vunpack.i.l.s16 %v1746_v25 }
 0x391   : > { %2229 = vmatpush.bf16.msrb.mxu2 %v3037_v63 }
 0x392   : > { %v1752_v40 = vrot.slane %v2723_v33, 1  ;;  %v1915_v3 = vrot.slane %v2723_v33, 2  ;;  %v2003_v59 = vrot.slane %v2723_v33, 3 }
 0x394   : > { %v1724_v29 = vld [vmem:[%s3813_s12 + $0x4] sm:$0xf] }
 0x395   : > { %v1726_v30 = vpack.c.bf16 %v1724_v29, %v1724_v29  ;;  %2230 = vmatpush.bf16.msrb.mxu2 %v3036_v0 }
 0x397   : > { %v1747_v35 = vunpack.c.l.b16 %v1726_v30 }
 0x399   : > { %v2724_v39 = vunpack.i.l.s16 %v1747_v35  ;;  %2231 = vmatpush.bf16.msrb.mxu2 %v3035_v1 }
 0x39b   : > { %v1754_v41 = vsel %vm1753_vm7, %v2724_v39, %v1752_v40  ;;  %v1830_v47 = vrot.slane %v2724_v39, 7  ;;  %v1916_v37 = vrot.slane %v2724_v39, 1  ;;  %v2004_v55 = vrot.slane %v2724_v39, 2 }
 0x39c   : > { %v1755_v31 = vpack.c.b16 %v1754_v41, %v1754_v41  ;;  %v2085_v41 = vperm.slane %v2082_v22, 1 }
 0x39d   : > { %v1831_v45 = vsel %vm1753_vm7, %v1830_v47, %v2723_v33  ;;  %v1917_v46 = vsel %vm1753_vm7, %v1916_v37, %v1915_v3  ;;  %v2005_v60 = vsel %vm1753_vm7, %v2004_v55, %v2003_v59  ;;  %2232 = vmatpush.bf16.msrb.mxu2 %v3034_v8 }
 0x39e   : > { %2757 = vmatmul.msk.bf16.vlgmr.msrb.gmra.mxu3 %vm671_vm1, %v1755_v31  ;;  %v1832_v13 = vpack.c.b16 %v1831_v45, %v1831_v45  ;;  %v1918_v32 = vpack.c.b16 %v1917_v46, %v1917_v46  ;;  %v2006_v61 = vpack.c.b16 %v2005_v60, %v2005_v60  ;;  %v3125_v45 = vld [vmem:[%s651_s14] ss:$0 sm:$0xff] }
 0x39f   : > { %1983 = vmatpush.bf16.msrb.mxu3 %v1964_v42 }
 0x3a0   : > { %2791 = vmatmul.msk.bf16.vlgmr.msrb.gmra.mxu0 %vm671_vm1, %v1832_v13  ;;  %2792 = vmatmul.msk.bf16.vlgmr.msra.gmra.mxu1 %vm671_vm1, %v1832_v13 }
 0x3a1   : > { %2833 = vmatmul.msk.bf16.vlgmr.msra.gmra.mxu2 %vm671_vm1, %v1918_v32 }
 0x3a2   : > { %2233 = vmatpush.bf16.msrb.mxu2 %v3033_v6 }
 0x3a3   : > { %1984 = vmatpush.bf16.msrb.mxu3 %v2824_v49 }
 0x3a7   : > { %1985 = vmatpush.bf16.msrb.mxu3 %v2816_v52 }
 0x3ab   : > { %1986 = vmatpush.bf16.msrb.mxu3 %v2808_v58 }
 0x3ae   : > { %2758 = vmatmul.msk.bf16.vlgmr.msra.gmra.mxu3 %vm671_vm1, %v1755_v31 }
 0x3af   : > { %2239 = vmatpush.bf16.msra.mxu3 %v3048_v2 }
 0x3b0   : > { %2875 = vmatmul.msk.bf16.vlgmr.msra.gmra.mxu0 %vm671_vm1, %v2006_v61  ;;  %2876 = vmatmul.msk.bf16.vlgmr.msrb.gmra.mxu1 %vm671_vm1, %v2006_v61 }
 0x3b3   : > { %2240 = vmatpush.bf16.msra.mxu3 %v3047_v5 }
 0x3b7   : > { %2241 = vmatpush.bf16.msra.mxu3 %v3046_v7 }
 0x3bb   : > { %2242 = vmatpush.bf16.msra.mxu3 %v3045_v9 }
 0x3be   : > { %2834 = vmatmul.msk.bf16.vlgmr.msrb.gmra.mxu3 %vm671_vm1, %v1918_v32 }
 0x3bf   : > { %2243 = vmatpush.bf16.msra.mxu3 %v3044_v4 }
 0x3c3   : > { %2244 = vmatpush.bf16.msra.mxu3 %v3043_v15 }
 0x3c7   : > { %2245 = vmatpush.bf16.msra.mxu3 %v3042_v24 }
 0x3cb   : > { %2246 = vmatpush.bf16.msra.mxu3 %v3041_v26 }
 0x41d   : > { %v1889_v10 = vpop.f32.mrf.mxu0  ;;  %v1902_v11 = vpop.f32.mrf.mxu1 }
 0x421   : > { %v1813_v14 = vpop.f32.mrf.mxu3 }
 0x422   : > { %v1890_v20 = vadd.f32 %v1889_v10, %v1813_v14 }
 0x424   : > { %v1975_v16 = vpop.f32.mrf.mxu2 }
 0x425   : > { %v1891_v17 = vpop.f32.mrf.mxu0  ;;  %v1904_v18 = vpop.f32.mrf.mxu1  ;;  %v1992_v27 = vadd.f32 %v1975_v16, %v1890_v20 }
 0x429   : > { %v1815_v21 = vpop.f32.mrf.mxu3 }
 0x42c   : > { %v1977_v57 = vpop.f32.mrf.mxu2 }
 0x42d   : > { %v2063_v36 = vpop.f32.mrf.mxu0  ;;  %v2076_v19 = vpop.f32.mrf.mxu1 }
 0x42e   : > { %v2080_v23 = vadd.f32 %v2063_v36, %v1992_v27 }
 0x430   : > { %v2088_v25 = vadd.f32 %v2084_v28, %v2080_v23 }
 0x431   : > { %v1826_v29 = vpop.f32.mrf.mxu3 }
 0x432   : > { %v2090_v30 = vmax.f32 %v2088_v25, 0.0  ;;  %v1903_v38 = vadd.f32 %v1902_v11, %v1826_v29 }
 0x434   : > { %v2092_v33 = vpack.c.bf16 %v2090_v30, %v2090_v30 }
 0x435   : > { %v2065_v12 = vpop.f32.mrf.mxu0  ;;  %v2078_v34 = vpop.f32.mrf.mxu1 }
 0x436   : > { %2234 = vmatmul.bf16.vlgmr.msrb.gmra.mxu2 %v2092_v33 }
 0x439   : > { %v1828_v35 = vpop.f32.mrf.mxu3 }
 0x441   : > { %v1988_v39 = vpop.f32.mrf.mxu3 }
 0x442   : > { %v1993_v40 = vadd.f32 %v1988_v39, %v1903_v38 }
 0x444   : > { %v2081_v47 = vadd.f32 %v2076_v19, %v1993_v40 }
 0x446   : > { %v2089_v3 = vadd.f32 %v2085_v41, %v2081_v47 }
 0x448   : > { %v2091_v37 = vmax.f32 %v2089_v3, 0.0 }
 0x449   : > { %v1990_v31 = vpop.f32.mrf.mxu3 }
 0x44a   : > { %v2093_v42 = vpack.c.bf16 %v2091_v37, %v2091_v37 }
 0x44c   : > { %2247 = vmatmul.bf16.vlgmr.msra.gmra.mxu3 %v2093_v42 }
 0x4b9   : > { %v2235_v43 = vpop.f32.mrf.mxu2 }
 0x4ba   : > { %v2236_v46 = vadd.f32 %v3125_v45, %v2235_v43 }
 0x4c1   : > { %v2237_v44 = vpop.f32.mrf.mxu2 }
 0x4cf   : > { %v2248_v13 = vpop.f32.mrf.mxu3 }
 0x4d0   : > { %v2249_v32 = vadd.f32 %v2248_v13, %v2236_v46 }
 0x4d2   : > { %2252 = vst [vmem:[%s660_s30] sm:$0x3] %v2249_v32 }
 0x4d7   : > { %v2250_v48 = vpop.f32.mrf.mxu3 }
 0x4d8 PF: > { %s3959_s24 = sld [smem:[#allocation15_spill]]  ;;  %s3962_s21 = smov %s3246_s22 }
 0x4d9   : > { %s3960_s20 = sld [smem:[#allocation14_spill]] }
 0x4da   : > { %s3961_s23 = sld [smem:[#allocation16_spill]] }
 0x4de   : > { %p26_p7 = scmp.ge.s32.totalorder %s3959_s24, 4  }
 0x4df   : > { %s3963_s22 = smov %s3960_s20 }
 0x4e0   :  { %28 = sbr.rel (!%p26_p7) target bundleno = 11 (0xb), region = 173 }
 0x4e5   :  { %2288 = vsyncpa [#allocation8], 1 }
 0x4e6   :  { %2290 = vsyncpa [#allocation8 + $0x1], 1 }
 0x4e7   :  { %2291 = vsyncpa [#allocation10], 1 }
 0x4e8   :  { %2293 = vsyncpa [#allocation10 + $0x1], 1 }

</bundles_post_ra>
